<compile_context>
chip_gen: v7x
topology: tpu7x:2x2x1
jax: 0.10.0
libtpu: 0.0.40
codegen_flags: <defaults>
</compile_context>

<pallas_src>
import numpy as np
import jax
import jax.numpy as jnp
from jax.experimental import pallas as pl
from jax.experimental.pallas import tpu as pltpu


# ----------------------------------------------------------------------------- helpers

def _tpu_generation():
    """Best-effort TPU generation (5 = v5e/v5p, 6 = v6e, 7 = v7x)."""
    try:
        kind = jax.devices()[0].device_kind.lower()
    except Exception:
        return 6
    for g in (7, 6, 5, 4, 3, 2):
        if f"v{g}" in kind:
            return g
    return 6


def choose_n_tile(N, gen=None):
    gen = _tpu_generation() if gen is None else gen
    # v5e: 128-wide MXU + f32 dequant temps -> 128 costs nothing; v6e/v7x: 256.
    prefs = (256, 128) if gen >= 6 else (128, 256)
    for cand in prefs:
        if N % cand == 0:
            return cand
    return N  # TODO(synk): pad N to a 128-multiple instead (masked stores otherwise)


def choose_k_tile(K, group_size, num_bits):
    vals = 16 // num_bits
    quantum = int(np.lcm(group_size, 8 * vals))   # k_tile % group_size == 0, ktp % 8 == 0
    for cand in (512, 1024, 256, 128, 2048):
        if K % cand == 0 and cand % quantum == 0:
            return cand
    return K


def choose_m_tile(M):
    if M <= 512:
        return M              # decode / small prefill: one M block
    for cand in (512, 256, 128, 64, 32, 16, 8):
        if M % cand == 0:
            return cand
    return M                  # TODO(synk): pad M for ragged prefill batches


def pack_indices_k_major(idx_np, num_bits, k_tile):
    """Pack (N, K) indices in [0, 2**num_bits) into an int16 (K // vals, N) buffer.

    K-major layout: within each k_tile chunk, packed row kp's bit-field j holds the
    index for k_local = j * ktp + kp (ktp = k_tile // vals), so the TPU kernel
    reassembles the K axis with a cheap sublane concatenate and feeds the MXU in its
    native (M,K)x(K,N) orientation (no RHS transpose).
    """
    N, K = idx_np.shape
    vals = 16 // num_bits
    assert K % k_tile == 0 and k_tile % vals == 0
    ktp = k_tile // vals
    idx_r = idx_np.reshape(N, K // k_tile, vals, ktp).astype(np.uint32)
    packed = np.zeros((N, K // k_tile, ktp), dtype=np.uint32)
    for j in range(vals):
        packed |= idx_r[:, :, j, :] << (j * num_bits)
    packed = packed.reshape(N, K // vals).T                       # (K/vals, N)
    return np.ascontiguousarray(packed).astype(np.uint16).view(np.int16)


def make_qmap2_from_qmap(tables_np):
    """Synthetic analogue of flute.utils.make_qmap2_from_qmap (CUDA-only plumbing)."""
    b = tables_np.shape[0]
    q2 = np.zeros((b, b, 2), dtype=tables_np.dtype)
    q2[:, :, 0] = tables_np[None, :]
    q2[:, :, 1] = tables_np[:, None]
    return q2


# ----------------------------------------------------------------------------- kernel

def make_qgemm_kernel(num_bits, group_size, n_tile, k_tile):
    vals_per_i16 = 16 // num_bits
    ktp = k_tile // vals_per_i16
    gk = k_tile // group_size

    def kernel(tables_ref, x_ref, w_ref, s_ref, o_ref, acc_ref):
        # tables_ref: SMEM (2**num_bits,) f32 LUT
        # x_ref:      VMEM (m_tile, k_tile)        activations
        # w_ref:      VMEM (ktp, n_tile) int16     K-major packed indices
        # s_ref:      VMEM (gk, n_tile)            per-group scales for this k_tile
        # o_ref:      VMEM (m_tile, n_tile)        output tile (written at last k)
        # acc_ref:    VMEM (m_tile, n_tile) f32    accumulator scratch
        ki = pl.program_id(2)

        @pl.when(ki == 0)
        def _init():
            acc_ref[...] = jnp.zeros_like(acc_ref)

        # LUT entries as f32 scalars (SMEM reads, hoisted once per step).
        t = [tables_ref[i] for i in range(1 << num_bits)]

        # Per-group scales expanded along sublanes only (layout-natural collapse).
        s_blk = s_ref[...].astype(jnp.float32)                          # (gk, n_tile)
        s_exp = jnp.broadcast_to(s_blk[:, None, :], (gk, group_size, n_tile))
        s_exp = s_exp.reshape(k_tile, n_tile)                           # (k_tile, n_tile)

        w32 = w_ref[...].astype(jnp.int32)                              # (ktp, n_tile)

        def select_tree(bits, lo, span):
            # depth-first binary select tree: 2**num_bits - 1 selects
            if span == 2:
                return jnp.where(bits[0], t[lo + 1], t[lo])
            half = span // 2
            level = span.bit_length() - 2          # span == 2**(level + 1)
            return jnp.where(bits[level],
                             select_tree(bits, lo + half, half),
                             select_tree(bits, lo, half))

        parts = []
        for j in range(vals_per_i16):
            # Test bit (j*num_bits + b) of the packed word directly: no shifts, and
            # the 32-bit masks match the f32 select operands (no mask relayout).
            bits = [(w32 & (1 << (j * num_bits + b))) != 0 for b in range(num_bits)]
            vals_j = select_tree(bits, 0, 1 << num_bits)                # (ktp, n_tile) f32
            s_j = s_exp[j * ktp:(j + 1) * ktp, :]                       # (ktp, n_tile) f32
            parts.append((vals_j * s_j).astype(x_ref.dtype))            # single rounding

        # Cheap sublane concat of narrow bf16 slabs -> MXU-native RHS (k_tile, n_tile).
        w_dq = jnp.concatenate(parts, axis=0)

        acc_ref[...] += jnp.dot(x_ref[...], w_dq,
                                preferred_element_type=jnp.float32)

        @pl.when(ki == pl.num_programs(2) - 1)
        def _finalize():
            o_ref[...] = acc_ref[...].astype(o_ref.dtype)

    return kernel


# ----------------------------------------------------------------------------- wrapper

def flute_linear_forward(x, weight_packed, scales, tables, num_bits, group_size,
                         bias=None, *, k_tile=None, n_tile=None, m_tile=None):
    """x: (M, K); weight_packed: (K // (16 // num_bits), N) int16 (packed with
    pack_indices_k_major and the SAME k_tile); scales: (N, G); tables: (2**num_bits,).
    Returns (M, N) in x.dtype."""
    M, K = x.shape
    N, G = scales.shape
    assert num_bits in (2, 4, 8), (
        "num_bits must divide 16 (2/4/8); FLUTE's 3-bit mode is not supported here")
    vals = 16 // num_bits
    assert weight_packed.shape == (K // vals, N)
    assert K % group_size == 0 and G == K // group_size
    assert N % 128 == 0, "out_features must be a multiple of 128 (lane-dense stores)"

    gen = _tpu_generation()
    if n_tile is None:
        n_tile = choose_n_tile(N, gen)
    if k_tile is None:
        k_tile = choose_k_tile(K, group_size, num_bits)
    if m_tile is None:
        m_tile = choose_m_tile(M)
    assert N % n_tile == 0
    assert K % k_tile == 0 and k_tile % group_size == 0
    assert k_tile % vals == 0 and (k_tile // vals) % 8 == 0
    assert M % m_tile == 0

    ktp = k_tile // vals
    gk = k_tile // group_size
    num_m, num_n, num_k = M // m_tile, N // n_tile, K // k_tile

    # Scales in K-major, grouped per k_tile: (num_k, gk, N).  Tiny host-side reshape.
    scales_km = jnp.transpose(scales).reshape(num_k, gk, N)

    kernel = make_qgemm_kernel(num_bits, group_size, n_tile, k_tile)

    w_spec_kwargs = {}
    if gen <= 5 and num_k > 1:
        # v5e: lowest HBM BW; 3-deep buffering of the packed-weight stream hides DMA
        # behind the VPU-heavy dequant.
        w_spec_kwargs["pipeline_mode"] = pl.Buffered(3)

    cost = pl.CostEstimate(
        flops=2 * M * N * K,
        transcendentals=0,
        bytes_accessed=(N * K * num_bits) // 8
        + M * K * x.dtype.itemsize
        + M * N * x.dtype.itemsize
        + N * G * scales.dtype.itemsize)

    out = pl.pallas_call(
        kernel,
        out_shape=jax.ShapeDtypeStruct((M, N), x.dtype),
        grid=(num_m, num_n, num_k),
        in_specs=[
            pl.BlockSpec(memory_space=pltpu.MemorySpace.SMEM),              # tables LUT
            pl.BlockSpec((m_tile, k_tile), lambda mi, ni, ki: (mi, ki)),    # x
            pl.BlockSpec((ktp, n_tile), lambda mi, ni, ki: (ki, ni),        # packed w
                         **w_spec_kwargs),
            pl.BlockSpec((None, gk, n_tile), lambda mi, ni, ki: (ki, 0, ni)),  # scales
        ],
        out_specs=pl.BlockSpec((m_tile, n_tile), lambda mi, ni, ki: (mi, ni)),
        scratch_shapes=[pltpu.VMEM((m_tile, n_tile), jnp.float32)],
        compiler_params=pltpu.CompilerParams(
            dimension_semantics=("parallel", "parallel", "arbitrary"),
            vmem_limit_bytes=32 * 1024 * 1024),
        cost_estimate=cost,
    )(tables.astype(jnp.float32), x, weight_packed, scales_km)

    if bias is not None:
        out = out + bias[None, :].astype(out.dtype)
    return out


# ----------------------------------------------------------------------------- demo

if __name__ == "__main__":
    # Small FluteLinear config.  grid = (2 m-tiles, 2 n-tiles, 2 k-steps) so the
    # parallel M/N axes and the K accumulator path are all exercised.
    in_features = 256        # K
    out_features = 512       # N
    num_bits = 4
    group_size = 64
    M = 32                   # tokens / batch rows
    dtype = jnp.bfloat16
    k_tile = 128
    m_tile = 16

    K, N = in_features, out_features
    G = K // group_size

    key = jax.random.PRNGKey(0)
    k_x, k_idx, k_s = jax.random.split(key, 3)

    # Deterministic synthetic parameters matching FluteLinear.__init__ buffer shapes.
    idx = np.asarray(jax.random.randint(k_idx, (N, K), 0, 1 << num_bits),
                     dtype=np.int32)                                      # (N, K)
    weight_packed = jnp.asarray(pack_indices_k_major(idx, num_bits, k_tile))
    scales = (0.01 + 0.04 * jax.random.uniform(k_s, (N, G))).astype(dtype)
    tables = jnp.arange(1 << num_bits, dtype=dtype)                       # (2**nb,)
    tables2 = jnp.asarray(make_qmap2_from_qmap(
        np.arange(1 << num_bits, dtype=np.float32)))
    # TODO(synk): tables2 / workspace / num_sms / template_id are CUDA stream-K
    # plumbing for the fused FLUTE kernel; they do not affect the math and are
    # unused by the TPU path.

    x = jax.random.normal(k_x, (M, K), dtype=jnp.float32).astype(dtype)

    out = flute_linear_forward(x, weight_packed, scales, tables,
                               num_bits, group_size,
                               k_tile=k_tile, m_tile=m_tile)
    out = jax.block_until_ready(out)
    assert out.shape == (M, N) and out.dtype == dtype

    # Pure-numpy reference of the qgemm semantics.
    lut = np.arange(1 << num_bits, dtype=np.float32)
    w_dq_ref = lut[idx] * np.repeat(np.asarray(scales, dtype=np.float32),
                                    group_size, axis=1)                   # (N, K)
    ref = np.asarray(x, dtype=np.float32) @ w_dq_ref.T                    # (M, N)

    np.testing.assert_allclose(np.asarray(out, dtype=np.float32), ref,
                               rtol=2e-2, atol=2.5e-1)
    print("KERNEL_OK")
</pallas_src>

<mosaic_0001>
module attributes {stable_mosaic.version = 11 : i64} {
  func.func @kernel(%arg0: i32, %arg1: i32, %arg2: i32, %arg3: memref<16xf32, #tpu.memory_space<smem>>, %arg4: memref<16x128xbf16, #tpu.memory_space<vmem>>, %arg5: memref<32x256xi16, #tpu.memory_space<vmem>>, %arg6: memref<1x2x256xbf16, #tpu.memory_space<vmem>>, %arg7: memref<16x256xbf16, #tpu.memory_space<vmem>>, %arg8: memref<16x256xf32, #tpu.memory_space<vmem>>) attributes {dimension_semantics = [#tpu.dimension_semantics<parallel>, #tpu.dimension_semantics<parallel>, #tpu.dimension_semantics<arbitrary>], iteration_bounds = array<i64: 2, 2, 2>, scalar_prefetch = 0 : i64, scratch_operands = 1 : i64, tpu.core_type = #tpu.core_type<tc>, window_params = [{transform_indices = @transform_0, window_bounds = array<i64: 16>}, {transform_indices = @transform_1, window_bounds = array<i64: 16, 128>}, {transform_indices = @transform_2, window_bounds = array<i64: 32, 256>}, {transform_indices = @transform_3, window_bounds = array<i64: 1, 2, 256>}, {transform_indices = @transform_4, window_bounds = array<i64: 16, 256>}]} {
    %c0_i32 = arith.constant 0 : i32
    %0 = arith.cmpi eq, %arg2, %c0_i32 : i32
    %1 = arith.extui %0 : i1 to i32
    %c0_i32_0 = arith.constant 0 : i32
    %2 = arith.cmpi ne, %1, %c0_i32_0 : i32
    scf.if %2 {
      %cst_30 = arith.constant 0.000000e+00 : f32
      %237 = vector.broadcast %cst_30 : f32 to vector<16x256xf32>
      %c0_31 = arith.constant 0 : index
      %c0_32 = arith.constant 0 : index
      %238 = vector.load %arg8[%c0_31, %c0_32] : memref<16x256xf32, #tpu.memory_space<vmem>>, vector<16x256xf32>
      tpu.vector_store %arg8[%c0_31, %c0_32], %237 {strides = array<i32>} : memref<16x256xf32, #tpu.memory_space<vmem>>, vector<16x256xf32>,
    } else {
    }
    %c0 = arith.constant 0 : index
    %3 = memref.load %arg3[%c0] : memref<16xf32, #tpu.memory_space<smem>>
    %c1 = arith.constant 1 : index
    %4 = memref.load %arg3[%c1] : memref<16xf32, #tpu.memory_space<smem>>
    %c2 = arith.constant 2 : index
    %5 = memref.load %arg3[%c2] : memref<16xf32, #tpu.memory_space<smem>>
    %c3 = arith.constant 3 : index
    %6 = memref.load %arg3[%c3] : memref<16xf32, #tpu.memory_space<smem>>
    %c4 = arith.constant 4 : index
    %7 = memref.load %arg3[%c4] : memref<16xf32, #tpu.memory_space<smem>>
    %c5 = arith.constant 5 : index
    %8 = memref.load %arg3[%c5] : memref<16xf32, #tpu.memory_space<smem>>
    %c6 = arith.constant 6 : index
    %9 = memref.load %arg3[%c6] : memref<16xf32, #tpu.memory_space<smem>>
    %c7 = arith.constant 7 : index
    %10 = memref.load %arg3[%c7] : memref<16xf32, #tpu.memory_space<smem>>
    %c8 = arith.constant 8 : index
    %11 = memref.load %arg3[%c8] : memref<16xf32, #tpu.memory_space<smem>>
    %c9 = arith.constant 9 : index
    %12 = memref.load %arg3[%c9] : memref<16xf32, #tpu.memory_space<smem>>
    %c10 = arith.constant 10 : index
    %13 = memref.load %arg3[%c10] : memref<16xf32, #tpu.memory_space<smem>>
    %c11 = arith.constant 11 : index
    %14 = memref.load %arg3[%c11] : memref<16xf32, #tpu.memory_space<smem>>
    %c12 = arith.constant 12 : index
    %15 = memref.load %arg3[%c12] : memref<16xf32, #tpu.memory_space<smem>>
    %c13 = arith.constant 13 : index
    %16 = memref.load %arg3[%c13] : memref<16xf32, #tpu.memory_space<smem>>
    %c14 = arith.constant 14 : index
    %17 = memref.load %arg3[%c14] : memref<16xf32, #tpu.memory_space<smem>>
    %c15 = arith.constant 15 : index
    %18 = memref.load %arg3[%c15] : memref<16xf32, #tpu.memory_space<smem>>
    %c0_1 = arith.constant 0 : index
    %c0_2 = arith.constant 0 : index
    %c0_3 = arith.constant 0 : index
    %19 = vector.load %arg6[%c0_1, %c0_2, %c0_3] : memref<1x2x256xbf16, #tpu.memory_space<vmem>>, vector<1x2x256xbf16>
    %20 = vector.shape_cast %19 : vector<1x2x256xbf16> to vector<2x256xbf16>
    %21 = arith.extf %20 : vector<2x256xbf16> to vector<2x256xf32>
    %22 = vector.shape_cast %21 : vector<2x256xf32> to vector<2x1x256xf32>
    %23 = vector.shape_cast %22 : vector<2x1x256xf32> to vector<2x1x256xf32>
    %24 = vector.broadcast %23 : vector<2x1x256xf32> to vector<2x64x256xf32>
    %25 = vector.shape_cast %24 : vector<2x64x256xf32> to vector<128x256xf32>
    %c0_4 = arith.constant 0 : index
    %c0_5 = arith.constant 0 : index
    %26 = vector.load %arg5[%c0_4, %c0_5] : memref<32x256xi16, #tpu.memory_space<vmem>>, vector<32x256xi16>
    %27 = arith.extsi %26 : vector<32x256xi16> to vector<32x256xi32>
    %c1_i32 = arith.constant 1 : i32
    %28 = vector.broadcast %c1_i32 : i32 to vector<32x256xi32>
    %29 = arith.andi %27, %28 : vector<32x256xi32>
    %c0_i32_6 = arith.constant 0 : i32
    %30 = vector.broadcast %c0_i32_6 : i32 to vector<32x256xi32>
    %31 = arith.cmpi ne, %29, %30 : vector<32x256xi32>
    %c2_i32 = arith.constant 2 : i32
    %32 = vector.broadcast %c2_i32 : i32 to vector<32x256xi32>
    %33 = arith.andi %27, %32 : vector<32x256xi32>
    %c0_i32_7 = arith.constant 0 : i32
    %34 = vector.broadcast %c0_i32_7 : i32 to vector<32x256xi32>
    %35 = arith.cmpi ne, %33, %34 : vector<32x256xi32>
    %c4_i32 = arith.constant 4 : i32
    %36 = vector.broadcast %c4_i32 : i32 to vector<32x256xi32>
    %37 = arith.andi %27, %36 : vector<32x256xi32>
    %c0_i32_8 = arith.constant 0 : i32
    %38 = vector.broadcast %c0_i32_8 : i32 to vector<32x256xi32>
    %39 = arith.cmpi ne, %37, %38 : vector<32x256xi32>
    %c8_i32 = arith.constant 8 : i32
    %40 = vector.broadcast %c8_i32 : i32 to vector<32x256xi32>
    %41 = arith.andi %27, %40 : vector<32x256xi32>
    %c0_i32_9 = arith.constant 0 : i32
    %42 = vector.broadcast %c0_i32_9 : i32 to vector<32x256xi32>
    %43 = arith.cmpi ne, %41, %42 : vector<32x256xi32>
    %44 = vector.broadcast %18 : f32 to vector<32x256xf32>
    %45 = vector.broadcast %17 : f32 to vector<32x256xf32>
    %46 = arith.select %31, %44, %45 : vector<32x256xi1>, vector<32x256xf32>
    %47 = vector.broadcast %16 : f32 to vector<32x256xf32>
    %48 = vector.broadcast %15 : f32 to vector<32x256xf32>
    %49 = arith.select %31, %47, %48 : vector<32x256xi1>, vector<32x256xf32>
    %50 = arith.select %35, %46, %49 : vector<32x256xi1>, vector<32x256xf32>
    %51 = vector.broadcast %14 : f32 to vector<32x256xf32>
    %52 = vector.broadcast %13 : f32 to vector<32x256xf32>
    %53 = arith.select %31, %51, %52 : vector<32x256xi1>, vector<32x256xf32>
    %54 = vector.broadcast %12 : f32 to vector<32x256xf32>
    %55 = vector.broadcast %11 : f32 to vector<32x256xf32>
    %56 = arith.select %31, %54, %55 : vector<32x256xi1>, vector<32x256xf32>
    %57 = arith.select %35, %53, %56 : vector<32x256xi1>, vector<32x256xf32>
    %58 = arith.select %39, %50, %57 : vector<32x256xi1>, vector<32x256xf32>
    %59 = vector.broadcast %10 : f32 to vector<32x256xf32>
    %60 = vector.broadcast %9 : f32 to vector<32x256xf32>
    %61 = arith.select %31, %59, %60 : vector<32x256xi1>, vector<32x256xf32>
    %62 = vector.broadcast %8 : f32 to vector<32x256xf32>
    %63 = vector.broadcast %7 : f32 to vector<32x256xf32>
    %64 = arith.select %31, %62, %63 : vector<32x256xi1>, vector<32x256xf32>
    %65 = arith.select %35, %61, %64 : vector<32x256xi1>, vector<32x256xf32>
    %66 = vector.broadcast %6 : f32 to vector<32x256xf32>
    %67 = vector.broadcast %5 : f32 to vector<32x256xf32>
    %68 = arith.select %31, %66, %67 : vector<32x256xi1>, vector<32x256xf32>
    %69 = vector.broadcast %4 : f32 to vector<32x256xf32>
    %70 = vector.broadcast %3 : f32 to vector<32x256xf32>
    %71 = arith.select %31, %69, %70 : vector<32x256xi1>, vector<32x256xf32>
    %72 = arith.select %35, %68, %71 : vector<32x256xi1>, vector<32x256xf32>
    %73 = arith.select %39, %65, %72 : vector<32x256xi1>, vector<32x256xf32>
    %74 = arith.select %43, %58, %73 : vector<32x256xi1>, vector<32x256xf32>
    %75 = vector.extract_strided_slice %25 {offsets = [0, 0], sizes = [32, 256], strides = [1, 1]} : vector<128x256xf32> to vector<32x256xf32>
    %76 = arith.mulf %74, %75 : vector<32x256xf32>
    %77 = arith.truncf %76 : vector<32x256xf32> to vector<32x256xbf16>
    %c16_i32 = arith.constant 16 : i32
    %78 = vector.broadcast %c16_i32 : i32 to vector<32x256xi32>
    %79 = arith.andi %27, %78 : vector<32x256xi32>
    %c0_i32_10 = arith.constant 0 : i32
    %80 = vector.broadcast %c0_i32_10 : i32 to vector<32x256xi32>
    %81 = arith.cmpi ne, %79, %80 : vector<32x256xi32>
    %c32_i32 = arith.constant 32 : i32
    %82 = vector.broadcast %c32_i32 : i32 to vector<32x256xi32>
    %83 = arith.andi %27, %82 : vector<32x256xi32>
    %c0_i32_11 = arith.constant 0 : i32
    %84 = vector.broadcast %c0_i32_11 : i32 to vector<32x256xi32>
    %85 = arith.cmpi ne, %83, %84 : vector<32x256xi32>
    %c64_i32 = arith.constant 64 : i32
    %86 = vector.broadcast %c64_i32 : i32 to vector<32x256xi32>
    %87 = arith.andi %27, %86 : vector<32x256xi32>
    %c0_i32_12 = arith.constant 0 : i32
    %88 = vector.broadcast %c0_i32_12 : i32 to vector<32x256xi32>
    %89 = arith.cmpi ne, %87, %88 : vector<32x256xi32>
    %c128_i32 = arith.constant 128 : i32
    %90 = vector.broadcast %c128_i32 : i32 to vector<32x256xi32>
    %91 = arith.andi %27, %90 : vector<32x256xi32>
    %c0_i32_13 = arith.constant 0 : i32
    %92 = vector.broadcast %c0_i32_13 : i32 to vector<32x256xi32>
    %93 = arith.cmpi ne, %91, %92 : vector<32x256xi32>
    %94 = vector.broadcast %18 : f32 to vector<32x256xf32>
    %95 = vector.broadcast %17 : f32 to vector<32x256xf32>
    %96 = arith.select %81, %94, %95 : vector<32x256xi1>, vector<32x256xf32>
    %97 = vector.broadcast %16 : f32 to vector<32x256xf32>
    %98 = vector.broadcast %15 : f32 to vector<32x256xf32>
    %99 = arith.select %81, %97, %98 : vector<32x256xi1>, vector<32x256xf32>
    %100 = arith.select %85, %96, %99 : vector<32x256xi1>, vector<32x256xf32>
    %101 = vector.broadcast %14 : f32 to vector<32x256xf32>
    %102 = vector.broadcast %13 : f32 to vector<32x256xf32>
    %103 = arith.select %81, %101, %102 : vector<32x256xi1>, vector<32x256xf32>
    %104 = vector.broadcast %12 : f32 to vector<32x256xf32>
    %105 = vector.broadcast %11 : f32 to vector<32x256xf32>
    %106 = arith.select %81, %104, %105 : vector<32x256xi1>, vector<32x256xf32>
    %107 = arith.select %85, %103, %106 : vector<32x256xi1>, vector<32x256xf32>
    %108 = arith.select %89, %100, %107 : vector<32x256xi1>, vector<32x256xf32>
    %109 = vector.broadcast %10 : f32 to vector<32x256xf32>
    %110 = vector.broadcast %9 : f32 to vector<32x256xf32>
    %111 = arith.select %81, %109, %110 : vector<32x256xi1>, vector<32x256xf32>
    %112 = vector.broadcast %8 : f32 to vector<32x256xf32>
    %113 = vector.broadcast %7 : f32 to vector<32x256xf32>
    %114 = arith.select %81, %112, %113 : vector<32x256xi1>, vector<32x256xf32>
    %115 = arith.select %85, %111, %114 : vector<32x256xi1>, vector<32x256xf32>
    %116 = vector.broadcast %6 : f32 to vector<32x256xf32>
    %117 = vector.broadcast %5 : f32 to vector<32x256xf32>
    %118 = arith.select %81, %116, %117 : vector<32x256xi1>, vector<32x256xf32>
    %119 = vector.broadcast %4 : f32 to vector<32x256xf32>
    %120 = vector.broadcast %3 : f32 to vector<32x256xf32>
    %121 = arith.select %81, %119, %120 : vector<32x256xi1>, vector<32x256xf32>
    %122 = arith.select %85, %118, %121 : vector<32x256xi1>, vector<32x256xf32>
    %123 = arith.select %89, %115, %122 : vector<32x256xi1>, vector<32x256xf32>
    %124 = arith.select %93, %108, %123 : vector<32x256xi1>, vector<32x256xf32>
    %125 = vector.extract_strided_slice %25 {offsets = [32, 0], sizes = [32, 256], strides = [1, 1]} : vector<128x256xf32> to vector<32x256xf32>
    %126 = arith.mulf %124, %125 : vector<32x256xf32>
    %127 = arith.truncf %126 : vector<32x256xf32> to vector<32x256xbf16>
    %c256_i32 = arith.constant 256 : i32
    %128 = vector.broadcast %c256_i32 : i32 to vector<32x256xi32>
    %129 = arith.andi %27, %128 : vector<32x256xi32>
    %c0_i32_14 = arith.constant 0 : i32
    %130 = vector.broadcast %c0_i32_14 : i32 to vector<32x256xi32>
    %131 = arith.cmpi ne, %129, %130 : vector<32x256xi32>
    %c512_i32 = arith.constant 512 : i32
    %132 = vector.broadcast %c512_i32 : i32 to vector<32x256xi32>
    %133 = arith.andi %27, %132 : vector<32x256xi32>
    %c0_i32_15 = arith.constant 0 : i32
    %134 = vector.broadcast %c0_i32_15 : i32 to vector<32x256xi32>
    %135 = arith.cmpi ne, %133, %134 : vector<32x256xi32>
    %c1024_i32 = arith.constant 1024 : i32
    %136 = vector.broadcast %c1024_i32 : i32 to vector<32x256xi32>
    %137 = arith.andi %27, %136 : vector<32x256xi32>
    %c0_i32_16 = arith.constant 0 : i32
    %138 = vector.broadcast %c0_i32_16 : i32 to vector<32x256xi32>
    %139 = arith.cmpi ne, %137, %138 : vector<32x256xi32>
    %c2048_i32 = arith.constant 2048 : i32
    %140 = vector.broadcast %c2048_i32 : i32 to vector<32x256xi32>
    %141 = arith.andi %27, %140 : vector<32x256xi32>
    %c0_i32_17 = arith.constant 0 : i32
    %142 = vector.broadcast %c0_i32_17 : i32 to vector<32x256xi32>
    %143 = arith.cmpi ne, %141, %142 : vector<32x256xi32>
    %144 = vector.broadcast %18 : f32 to vector<32x256xf32>
    %145 = vector.broadcast %17 : f32 to vector<32x256xf32>
    %146 = arith.select %131, %144, %145 : vector<32x256xi1>, vector<32x256xf32>
    %147 = vector.broadcast %16 : f32 to vector<32x256xf32>
    %148 = vector.broadcast %15 : f32 to vector<32x256xf32>
    %149 = arith.select %131, %147, %148 : vector<32x256xi1>, vector<32x256xf32>
    %150 = arith.select %135, %146, %149 : vector<32x256xi1>, vector<32x256xf32>
    %151 = vector.broadcast %14 : f32 to vector<32x256xf32>
    %152 = vector.broadcast %13 : f32 to vector<32x256xf32>
    %153 = arith.select %131, %151, %152 : vector<32x256xi1>, vector<32x256xf32>
    %154 = vector.broadcast %12 : f32 to vector<32x256xf32>
    %155 = vector.broadcast %11 : f32 to vector<32x256xf32>
    %156 = arith.select %131, %154, %155 : vector<32x256xi1>, vector<32x256xf32>
    %157 = arith.select %135, %153, %156 : vector<32x256xi1>, vector<32x256xf32>
    %158 = arith.select %139, %150, %157 : vector<32x256xi1>, vector<32x256xf32>
    %159 = vector.broadcast %10 : f32 to vector<32x256xf32>
    %160 = vector.broadcast %9 : f32 to vector<32x256xf32>
    %161 = arith.select %131, %159, %160 : vector<32x256xi1>, vector<32x256xf32>
    %162 = vector.broadcast %8 : f32 to vector<32x256xf32>
    %163 = vector.broadcast %7 : f32 to vector<32x256xf32>
    %164 = arith.select %131, %162, %163 : vector<32x256xi1>, vector<32x256xf32>
    %165 = arith.select %135, %161, %164 : vector<32x256xi1>, vector<32x256xf32>
    %166 = vector.broadcast %6 : f32 to vector<32x256xf32>
    %167 = vector.broadcast %5 : f32 to vector<32x256xf32>
    %168 = arith.select %131, %166, %167 : vector<32x256xi1>, vector<32x256xf32>
    %169 = vector.broadcast %4 : f32 to vector<32x256xf32>
    %170 = vector.broadcast %3 : f32 to vector<32x256xf32>
    %171 = arith.select %131, %169, %170 : vector<32x256xi1>, vector<32x256xf32>
    %172 = arith.select %135, %168, %171 : vector<32x256xi1>, vector<32x256xf32>
    %173 = arith.select %139, %165, %172 : vector<32x256xi1>, vector<32x256xf32>
    %174 = arith.select %143, %158, %173 : vector<32x256xi1>, vector<32x256xf32>
    %175 = vector.extract_strided_slice %25 {offsets = [64, 0], sizes = [32, 256], strides = [1, 1]} : vector<128x256xf32> to vector<32x256xf32>
    %176 = arith.mulf %174, %175 : vector<32x256xf32>
    %177 = arith.truncf %176 : vector<32x256xf32> to vector<32x256xbf16>
    %c4096_i32 = arith.constant 4096 : i32
    %178 = vector.broadcast %c4096_i32 : i32 to vector<32x256xi32>
    %179 = arith.andi %27, %178 : vector<32x256xi32>
    %c0_i32_18 = arith.constant 0 : i32
    %180 = vector.broadcast %c0_i32_18 : i32 to vector<32x256xi32>
    %181 = arith.cmpi ne, %179, %180 : vector<32x256xi32>
    %c8192_i32 = arith.constant 8192 : i32
    %182 = vector.broadcast %c8192_i32 : i32 to vector<32x256xi32>
    %183 = arith.andi %27, %182 : vector<32x256xi32>
    %c0_i32_19 = arith.constant 0 : i32
    %184 = vector.broadcast %c0_i32_19 : i32 to vector<32x256xi32>
    %185 = arith.cmpi ne, %183, %184 : vector<32x256xi32>
    %c16384_i32 = arith.constant 16384 : i32
    %186 = vector.broadcast %c16384_i32 : i32 to vector<32x256xi32>
    %187 = arith.andi %27, %186 : vector<32x256xi32>
    %c0_i32_20 = arith.constant 0 : i32
    %188 = vector.broadcast %c0_i32_20 : i32 to vector<32x256xi32>
    %189 = arith.cmpi ne, %187, %188 : vector<32x256xi32>
    %c32768_i32 = arith.constant 32768 : i32
    %190 = vector.broadcast %c32768_i32 : i32 to vector<32x256xi32>
    %191 = arith.andi %27, %190 : vector<32x256xi32>
    %c0_i32_21 = arith.constant 0 : i32
    %192 = vector.broadcast %c0_i32_21 : i32 to vector<32x256xi32>
    %193 = arith.cmpi ne, %191, %192 : vector<32x256xi32>
    %194 = vector.broadcast %18 : f32 to vector<32x256xf32>
    %195 = vector.broadcast %17 : f32 to vector<32x256xf32>
    %196 = arith.select %181, %194, %195 : vector<32x256xi1>, vector<32x256xf32>
    %197 = vector.broadcast %16 : f32 to vector<32x256xf32>
    %198 = vector.broadcast %15 : f32 to vector<32x256xf32>
    %199 = arith.select %181, %197, %198 : vector<32x256xi1>, vector<32x256xf32>
    %200 = arith.select %185, %196, %199 : vector<32x256xi1>, vector<32x256xf32>
    %201 = vector.broadcast %14 : f32 to vector<32x256xf32>
    %202 = vector.broadcast %13 : f32 to vector<32x256xf32>
    %203 = arith.select %181, %201, %202 : vector<32x256xi1>, vector<32x256xf32>
    %204 = vector.broadcast %12 : f32 to vector<32x256xf32>
    %205 = vector.broadcast %11 : f32 to vector<32x256xf32>
    %206 = arith.select %181, %204, %205 : vector<32x256xi1>, vector<32x256xf32>
    %207 = arith.select %185, %203, %206 : vector<32x256xi1>, vector<32x256xf32>
    %208 = arith.select %189, %200, %207 : vector<32x256xi1>, vector<32x256xf32>
    %209 = vector.broadcast %10 : f32 to vector<32x256xf32>
    %210 = vector.broadcast %9 : f32 to vector<32x256xf32>
    %211 = arith.select %181, %209, %210 : vector<32x256xi1>, vector<32x256xf32>
    %212 = vector.broadcast %8 : f32 to vector<32x256xf32>
    %213 = vector.broadcast %7 : f32 to vector<32x256xf32>
    %214 = arith.select %181, %212, %213 : vector<32x256xi1>, vector<32x256xf32>
    %215 = arith.select %185, %211, %214 : vector<32x256xi1>, vector<32x256xf32>
    %216 = vector.broadcast %6 : f32 to vector<32x256xf32>
    %217 = vector.broadcast %5 : f32 to vector<32x256xf32>
    %218 = arith.select %181, %216, %217 : vector<32x256xi1>, vector<32x256xf32>
    %219 = vector.broadcast %4 : f32 to vector<32x256xf32>
    %220 = vector.broadcast %3 : f32 to vector<32x256xf32>
    %221 = arith.select %181, %219, %220 : vector<32x256xi1>, vector<32x256xf32>
    %222 = arith.select %185, %218, %221 : vector<32x256xi1>, vector<32x256xf32>
    %223 = arith.select %189, %215, %222 : vector<32x256xi1>, vector<32x256xf32>
    %224 = arith.select %193, %208, %223 : vector<32x256xi1>, vector<32x256xf32>
    %225 = vector.extract_strided_slice %25 {offsets = [96, 0], sizes = [32, 256], strides = [1, 1]} : vector<128x256xf32> to vector<32x256xf32>
    %226 = arith.mulf %224, %225 : vector<32x256xf32>
    %227 = arith.truncf %226 : vector<32x256xf32> to vector<32x256xbf16>
    %228 = tpu.concatenate %77, %127, %177, %227 in 0 : vector<32x256xbf16>, vector<32x256xbf16>, vector<32x256xbf16>, vector<32x256xbf16> -> vector<128x256xbf16>
    %c0_22 = arith.constant 0 : index
    %c0_23 = arith.constant 0 : index
    %229 = vector.load %arg8[%c0_22, %c0_23] : memref<16x256xf32, #tpu.memory_space<vmem>>, vector<16x256xf32>
    %c0_24 = arith.constant 0 : index
    %c0_25 = arith.constant 0 : index
    %230 = vector.load %arg4[%c0_24, %c0_25] : memref<16x128xbf16, #tpu.memory_space<vmem>>, vector<16x128xbf16>
    %cst = arith.constant dense<0.000000e+00> : vector<16x256xf32>
    %231 = tpu.matmul %230, %228, %cst {dimension_numbers = #tpu.dot_dimension_numbers<[1], [0], [0], [1], [0, 0, 1, 1], [], []>} : vector<16x128xbf16>, vector<128x256xbf16>, vector<16x256xf32> -> vector<16x256xf32>
    %232 = arith.addf %229, %231 : vector<16x256xf32>
    %c0_26 = arith.constant 0 : index
    %c0_27 = arith.constant 0 : index
    %233 = vector.load %arg8[%c0_26, %c0_27] : memref<16x256xf32, #tpu.memory_space<vmem>>, vector<16x256xf32>
    tpu.vector_store %arg8[%c0_26, %c0_27], %232 {strides = array<i32>} : memref<16x256xf32, #tpu.memory_space<vmem>>, vector<16x256xf32>,
    %c1_i32_28 = arith.constant 1 : i32
    %234 = arith.cmpi eq, %arg2, %c1_i32_28 : i32
    %235 = arith.extui %234 : i1 to i32
    %c0_i32_29 = arith.constant 0 : i32
    %236 = arith.cmpi ne, %235, %c0_i32_29 : i32
    scf.if %236 {
      %c0_30 = arith.constant 0 : index
      %c0_31 = arith.constant 0 : index
      %237 = vector.load %arg8[%c0_30, %c0_31] : memref<16x256xf32, #tpu.memory_space<vmem>>, vector<16x256xf32>
      %238 = arith.truncf %237 : vector<16x256xf32> to vector<16x256xbf16>
      %c0_32 = arith.constant 0 : index
      %c0_33 = arith.constant 0 : index
      %239 = vector.load %arg7[%c0_32, %c0_33] : memref<16x256xbf16, #tpu.memory_space<vmem>>, vector<16x256xbf16>
      tpu.vector_store %arg7[%c0_32, %c0_33], %238 {strides = array<i32>} : memref<16x256xbf16, #tpu.memory_space<vmem>>, vector<16x256xbf16>,
    } else {
    }
    return
  }
  func.func @transform_0(%arg0: i32, %arg1: i32, %arg2: i32) -> i32 {
    %c0_i32 = arith.constant 0 : i32
    %c0_i32_0 = arith.constant 0 : i32
    return %c0_i32 : i32
  }
  func.func @transform_1(%arg0: i32, %arg1: i32, %arg2: i32) -> (i32, i32) {
    %c0_i32 = arith.constant 0 : i32
    return %arg0, %arg2 : i32, i32
  }
  func.func @transform_2(%arg0: i32, %arg1: i32, %arg2: i32) -> (i32, i32) {
    %c0_i32 = arith.constant 0 : i32
    return %arg2, %arg1 : i32, i32
  }
  func.func @transform_3(%arg0: i32, %arg1: i32, %arg2: i32) -> (i32, i32, i32) {
    %c0_i32 = arith.constant 0 : i32
    %c0_i32_0 = arith.constant 0 : i32
    return %arg2, %c0_i32, %arg1 : i32, i32, i32
  }
  func.func @transform_4(%arg0: i32, %arg1: i32, %arg2: i32) -> (i32, i32) {
    %c0_i32 = arith.constant 0 : i32
    return %arg0, %arg1 : i32, i32
  }
}

</mosaic_0001>

<bundles_post_ra>
// kernel: tpu_custom_call.1
= control target key start
LH: loop header
LB: loop body
LE: loop exit
PB: predicated region body
PF: predicated region fallthrough
CT: control target
= control target key end

     0   :  { %s4657_s0 = inlined_call_operand.hbm [shape: f32[16], index: 0, kind: input, shape index: {}]   ;;  %s4658_s1 = inlined_call_operand.hbm [shape: bf16[32,256], index: 1, kind: input, shape index: {}]   ;;  %s4659_s2 = inlined_call_operand.hbm [shape: s16[64,512], index: 2, kind: input, shape index: {}]   ;;  %s4660_s3 = inlined_call_operand.vmem [shape: bf16[2,2,512], index: 3, kind: input, shape index: {}]   ;;  %s4661_s4 = inlined_call_operand.hbm [shape: bf16[32,512], index: 4, kind: output, shape index: {}]  }
   0x1   :  { %4683 = sst [smem:[#allocation25_spill]] %s4657_s0 }
   0x2   :  { %4684 = sst [smem:[#allocation26_spill]] %s4658_s1 }
   0x3   :  { %4685 = sst [smem:[#allocation27_spill]] %s4659_s2 }
   0x4   :  { %4686 = sst [smem:[#allocation28_spill]] %s4660_s3 }
   0x5   :  { %4687 = sst [smem:[#allocation29_spill]] %s4661_s4 }
   0x6   :  { %9 = vsyncpa [#allocation6], 0 }
   0x7   :  { %10 = vsyncpa [#allocation4], 0 }
   0x8   :  { %12 = vsyncpa [#allocation4 + $0x1], 0 }
   0x9   :  { %13 = vsyncpa [#allocation9], 0 }
   0xa   :  { %15 = vsyncpa [#allocation9 + $0x1], 0 }
   0xb   :  { %16 = vsyncpa [#allocation5], 0 }
   0xc   :  { %18 = vsyncpa [#allocation5 + $0x1], 0  ;;  %s1962_s15 = smov 0   ;;  %s1964_s16 = smov 0  }
   0xd   :  { %s1966_s17 = smov 0   ;;  %s1968_s18 = smov 0  }
   0xe   :  { %s1970_s19 = smov 0   ;;  %s1972_s20 = smov 0  }
   0xf   :  { %s1974_s21 = smov 0   ;;  %s1976_s22 = smov 0  }
  0x10   :  { %s1978_s23 = smov 0   ;;  %s1980_s24 = smov 0  }
  0x11   :  { %s1982_s25 = smov 0   ;;  %s1984_s26 = smov 0  }
  0x12   :  { %s1986_s27 = smov 0   ;;  %s1988_s28 = smov 0  }
  0x13   :  { %s1990_s29 = smov 0   ;;  %s1992_s30 = smov 0  }
  0x14 LB: > { %4688 = sst [smem:[#allocation15_spill]] %s1860_s15  ;;  %s1454_s5 = sadd.s32 4294967295, %s1920_s30   ;;  %s1920_s30 = sphi %s1992_s30, %s24_s30   ;;  %s1916_s29 = sphi %s1990_s29, %s5012_s29   ;;  %s1912_s28 = sphi %s1988_s28, %s5011_s28   ;;  %s1908_s27 = sphi %s1986_s27, %s5010_s27   ;;  %s1904_s26 = sphi %s1984_s26, %s5009_s26   ;;  %s1900_s25 = sphi %s1982_s25, %s5008_s25   ;;  %s1896_s24 = sphi %s1980_s24, %s5007_s24   ;;  %s1892_s23 = sphi %s1978_s23, %s5006_s23   ;;  %s1888_s22 = sphi %s1976_s22, %s5005_s22   ;;  %s1884_s21 = sphi %s1974_s21, %s5004_s21   ;;  %s1880_s20 = sphi %s1972_s20, %s5003_s20   ;;  %s1876_s19 = sphi %s1970_s19, %s5002_s19   ;;  %s1872_s18 = sphi %s1968_s18, %s5001_s18   ;;  %s1868_s17 = sphi %s1966_s17, %s5000_s17   ;;  %s1864_s16 = sphi %s1964_s16, %s4999_s16   ;;  %s1860_s15 = sphi %s1962_s15, %s4996_s15  }
  0x15   : > { %4689 = sst [smem:[#allocation16_spill]] %s1864_s16  ;;  %s1455_s6 = sadd.s32 4294967294, %s1920_s30  }
  0x16   : > { %4690 = sst [smem:[#allocation17_spill]] %s1896_s24  ;;  %p80_p0 = scmp.ne.s32.totalorder %s1892_s23, %s1888_s22 }
  0x17   : > { %4691 = sst [smem:[#allocation18_spill]] %s1900_s25  ;;  %p81_p1 = scmp.eq.s32.totalorder %s1920_s30, 0 }
  0x18   : > { %4692 = sst [smem:[#allocation19_spill]] %s1904_s26  ;;  %p86_p2 = scmp.ne.s32.totalorder %s1888_s22, %s1884_s21 }
  0x19   : > { %4693 = sst [smem:[#allocation20_spill]] %s1920_s30  ;;  %p2045_p3 = scmp.eq.s32.totalorder %s1454_s5, 0 }
  0x1a   : > { %p2050_p4 = por %p81_p1, %p80_p0  ;;  %p108_p5 = scmp.ne.s32.totalorder %s1880_s20, %s1876_s19 }
  0x1b   : > { %s4694_s8 = scalar_select %p2045_p3, 1, 0 }
  0x1c   : > { %p2058_p6 = por %p2045_p3, %p86_p2  ;;  %p114_p7 = scmp.ne.s32.totalorder %s1876_s19, %s1872_s18 }
  0x1d   : > { %p2063_p8 = por %p108_p5, %p81_p1  ;;  %p167_p10 = scmp.ne.s32.totalorder %s1868_s17, %s1864_s16 }
  0x1e   : > { %s4696_s11 = scalar_select %p2058_p6, 1, 0 }
  0x1f   : > { %p2070_p9 = por %p114_p7, %p2045_p3  ;;  %p168_p11 = scmp.eq.s32.totalorder %s1454_s5, 7 }
  0x20   : > { %p173_p12 = scmp.ne.s32.totalorder %s1864_s16, %s1860_s15  ;;  %p174_p13 = scmp.eq.s32.totalorder %s1455_s6, 7 }
  0x21   : > { %s4698_s14 = scalar_select %p2070_p9, 1, 0 }
  0x22   : > { %p1456_p0 = scmp.ge.s32.totalorder %s1920_s30, 1  ;;  %p2079_p2 = por %p168_p11, %p167_p10 }
  0x23   : > { %p181_p1 = scmp.lt.s32.totalorder %s1920_s30, 9  ;;  %p2084_p5 = por %p174_p13, %p173_p12 }
  0x24   : > { %s4699_s21 = scalar_select %p2079_p2, 1, 0 }
  0x25   : > { %s4701_s18 = scalar_select %p2084_p5, 1, 0 }
  0x26   : > { %4700 = sst [smem:[#allocation21_spill]] %s4699_s21  ;;  %p2088_p6 = pnand %p1456_p0, %p181_p1 }
  0x27   : > { %4702 = sst [smem:[#allocation22_spill]] %s4701_s18  ;;  %p1533_p7 = scmp.lt.s32.totalorder %s1920_s30, 8 }
  0x28   : > { %s4703_s13 = scalar_select %p2088_p6, 1, 0 }
  0x29   : > { %p1517_p9 = pneg %p2088_p6  ;;  %p2097_p3 = pnand %p1533_p7, %p2050_p4 }
  0x2a   : > { %p2103_p10 = pnand %p1533_p7, %p2063_p8  ;;  %p4706_p11 = scmp.ne.s32.totalorder %s4694_s8, 0 }
  0x2b   : > { %s4707_s0 = sld [smem:[#allocation25_spill]] }
  0x2c   : > { %s4705_s6 = scalar_select %p2103_p10, 1, 0 }
  0x2d   : > { %p1518_p12 = pnand %p1517_p9, %p4706_p11 }
  0x2f   : > { %p1679_p0 = pneg %p1518_p12 }
  0x31   : > { %s1677_s18 = scalar_lea.hbm %s4707_s0, 16 }
  0x32   : > { %p1678_p13 = scmp.ne.s32.totalorder %s4707_s0, %s1677_s18  ;;  %p1684_p8 = scmp.lt.u32.totalorder %s1677_s18, %s4707_s0 }
  0x34   : > { %p1680_p4 = pnand %p1679_p0, %p1678_p13 }
  0x36   : > { %p1681_p1 = pneg %p1680_p4 }
  0x38   : > { %p1686_p7 = pnand %p1684_p8, %p1681_p1 }
  0x3a   : > { %1689 = shalt.err (!%p1686_p7)
}
  0x3b   : > { %s1922_s12 = smov [#allocation3]   ;;  %s36_s30 = sadd.s32 1, %s1908_s27 }
  0x3c   : > { %1520 = dma.hbm_to_smem (!%p1518_p12), %s4707_s0, 16, %s1922_s12, [#allocation6]  }
  0x3d   : > { %s203_s7 = sand.u32 1, %s1892_s23   ;;  %p2124_p9 = scmp.ge.s32.totalorder %s36_s30, 2 }
  0x3e   : > { %s1459_s9 = sshll.u32 %s203_s7, 3  ;;  %s1502_s18 = sshll.u32 %s1916_s29, 2 }
  0x3f   : > { %s5014_s30 = smov (%p2124_p9, %s36_s30), 0  ;;  %s213_s26 = sadd.s32 %s1908_s27, %s1502_s18 }
  0x40   : > { %4709 = sst [smem:[#allocation23_spill]] %s5014_s30  ;;  %s2136_s21 = ssub.s32 %s1908_s27, %s5014_s30 }
  0x41   : > { %s1462_s10 = sshll.u32 %s213_s26, 6  ;;  %s4710_s1 = sld [smem:[#allocation26_spill]] }
  0x42   : > { %s207_s3 = scalar_lea.vmem [#allocation7], %s1459_s9  ;;  %s2145_s25 = scalar_lea.sflag [#allocation4], %s203_s7 }
  0x43   : > { %s216_s24 = sshll.u32 %s207_s3, 4  ;;  %p1692_p12 = pneg %p2097_p3  ;;  %s2143_s24 = int_to_ptr.vmem [resolvable:$true] %s216_s24 }
  0x47   : > { %s2141_s0 = scalar_lea.hbm %s4710_s1, %s1462_s10  ;;  %s1695_s26 = scalar_lea.hbm %s4710_s1, 512 }
  0x48   : > { %s1690_s16 = scalar_lea.hbm %s2141_s0, 128  ;;  %p1696_p4 = scmp.lt.u32.totalorder %s2141_s0, %s4710_s1 }
  0x49   : > { %p1691_p11 = scmp.ne.s32.totalorder %s2141_s0, %s1690_s16  ;;  %p1697_p1 = scmp.lt.u32.totalorder %s1695_s26, %s1690_s16 }
  0x4a   : > { %p1699_p7 = scmp.lt.u32.totalorder %s1690_s16, %s2141_s0 }
  0x4b   : > { %p1693_p13 = pnand %p1692_p12, %p1691_p11  ;;  %p1698_p8 = por %p1697_p1, %p1696_p4 }
  0x4d   : > { %p1694_p0 = pneg %p1693_p13  ;;  %p1700_p5 = por %p1699_p7, %p1698_p8 }
  0x4f   : > { %p1701_p2 = pnand %p1700_p5, %p1694_p0 }
  0x51   : > { %1704 = shalt.err (!%p1701_p2)
}
  0x52   : > { %s1705_s3 = scalar_lea.vmem %s2143_s24, 128  ;;  %s1923_s7 = smov [#allocation7]  }
  0x53   : > { %p1706_p11 = scmp.ne.s32.totalorder %s2143_s24, %s1705_s3  ;;  %s1710_s9 = sshll.u32 %s1923_s7, 4  ;;  %s1711_s9 = int_to_ptr.vmem [resolvable:$false] %s1710_s9 }
  0x54   : > { %s1712_s15 = scalar_lea.vmem %s1711_s9, 256  ;;  %p1713_p10 = scmp.lt.s32.totalorder %s2143_s24, %s1711_s9 }
  0x55   : > { %p1708_p13 = pnand %p1706_p11, %p1692_p12  ;;  %p1714_p4 = scmp.lt.s32.totalorder %s1712_s15, %s1705_s3 }
  0x57   : > { %p1709_p6 = pneg %p1708_p13  ;;  %p1715_p1 = por %p1714_p4, %p1713_p10 }
  0x59   : > { %p1716_p8 = pnand %p1715_p1, %p1709_p6 }
  0x5b   : > { %1719 = shalt.err (!%p1716_p8)
}
  0x5c   : > { %s4680_s16 = smov 128   ;;  %s1925_s18 = smov 64  }
  0x5d   : > { %s1926_s26 = smov 4   ;;  %s226_s10 = sand.u32 1, %s1880_s20  }
  0x5e   : > { %1524 = dma.hbm_to_vmem [thread:$0]  (!%p2097_p3), %s2141_s0, 128, %s2143_s24, %s2145_s25, %s4680_s16, %s1925_s18, %s1926_s26  }
  0x5f   : > { %s39_s12 = sadd.s32 1, %s1912_s28  ;;  %s1463_s3 = sshll.u32 %s226_s10, 5 }
  0x60   : > { %s5016_s12 = smov (!%p2124_p9, %s39_s12), %s1912_s28  ;;  %s1465_s7 = sshll.u32 %s1912_s28, 1 }
  0x61   : > { %p41_p6 = scmp.ge.s32.totalorder %s5016_s12, 2  ;;  %s1503_s9 = sshll.u32 %s1908_s27, 4 }
  0x62   : > { %s237_s15 = sadd.s32 %s1503_s9, %s1465_s7  ;;  %s230_s1 = scalar_lea.vmem [#allocation8], %s1463_s3 }
  0x63   : > { %s240_s30 = sshll.u32 %s230_s1, 4  ;;  %s5018_s12 = smov (%p41_p6, %s5016_s12), 0  ;;  %s2203_s30 = int_to_ptr.vmem [resolvable:$true] %s240_s30 }
  0x64   : > { %4711 = sst [smem:[#allocation24_spill]] %s5018_s12  ;;  %s4712_s5 = sadd.s32 1, %s1916_s29 }
  0x65   : > { %s5020_s5 = smov (!%p41_p6, %s4712_s5), %s1916_s29  ;;  %s97_s0 = ssub.s32 %s1912_s28, %s5018_s12 }
  0x66   : > { %s1467_s24 = sshll.u32 %s237_s15, 6  ;;  %p45_p3 = scmp.ge.s32.totalorder %s5020_s5, 2 }
  0x67   : > { %s98_s25 = sor.u32 %s97_s0, %s2136_s21  ;;  %s4713_s2 = sld [smem:[#allocation27_spill]] }
  0x68   : > { %p99_p2 = scmp.eq.s32.totalorder %s98_s25, 0  ;;  %s5022_s5 = smov (%p45_p3, %s5020_s5), 0 }
  0x69   : > { %s4714_s26 = sadd.s32 1, %s1880_s20  ;;  %s68_s7 = ssub.s32 %s1916_s29, %s5022_s5 }
  0x6a   : > { %s2199_s3 = scalar_select %p99_p2, %s1880_s20, %s4714_s26  }
  0x6b   : > { %s70_s9 = sor.u32 %s2136_s21, %s68_s7  ;;  %s154_s15 = sor.u32 %s97_s0, %s68_s7 }
  0x6c   : > { %p71_p5 = scmp.eq.s32.totalorder %s70_s9, 0  ;;  %p155_p10 = scmp.eq.s32.totalorder %s154_s15, 0 }
  0x6d   : > { %s2192_s1 = scalar_lea.hbm %s4713_s2, %s1467_s24  ;;  %s4715_s25 = sadd.s32 1, %s1892_s23 }
  0x6e   : > { %s2209_s24 = scalar_select %p71_p5, %s1892_s23, %s4715_s25  }
  0x6f   : > { %s4716_s4 = sadd.s32 1, %s1868_s17  ;;  %s2216_s16 = scalar_lea.sflag [#allocation9], %s226_s10 }
  0x70   : > { %s2214_s18 = scalar_select %p155_p10, %s1868_s17, %s4716_s4  }
  0x71   : > { %s1720_s12 = scalar_lea.hbm %s2192_s1, 512  ;;  %p4717_p12 = scmp.ne.s32.totalorder %s4705_s6, 0 }
  0x72   : > { %p1721_p9 = scmp.ne.s32.totalorder %s2192_s1, %s1720_s12  ;;  %s1725_s26 = scalar_lea.hbm %s4713_s2, 2048 }
  0x73   : > { %p1722_p0 = pneg %p4717_p12  ;;  %p1726_p13 = scmp.lt.u32.totalorder %s2192_s1, %s4713_s2 }
  0x74   : > { %p1727_p4 = scmp.lt.u32.totalorder %s1725_s26, %s1720_s12  ;;  %p1729_p8 = scmp.lt.u32.totalorder %s1720_s12, %s2192_s1 }
  0x75   : > { %p1723_p7 = pnand %p1722_p0, %p1721_p9 }
  0x76   : > { %p1728_p1 = por %p1727_p4, %p1726_p13 }
  0x77   : > { %p1724_p11 = pneg %p1723_p7 }
  0x78   : > { %p1730_p6 = por %p1729_p8, %p1728_p1 }
  0x7a   : > { %p1731_p3 = pnand %p1730_p6, %p1724_p11 }
  0x7c   : > { %1734 = shalt.err (!%p1731_p3)
}
  0x7d   : > { %s1735_s10 = scalar_lea.vmem %s2203_s30, 512  ;;  %s1927_s15 = smov [#allocation8]  }
  0x7e   : > { %p1736_p2 = scmp.ne.s32.totalorder %s2203_s30, %s1735_s10  ;;  %s1740_s25 = sshll.u32 %s1927_s15, 4  ;;  %s1741_s25 = int_to_ptr.vmem [resolvable:$false] %s1740_s25 }
  0x7f   : > { %s1742_s4 = scalar_lea.vmem %s1741_s25, 1024  ;;  %p1743_p9 = scmp.lt.s32.totalorder %s2203_s30, %s1741_s25 }
  0x80   : > { %p1738_p5 = pnand %p1736_p2, %p1722_p0  ;;  %p1744_p7 = scmp.lt.s32.totalorder %s1742_s4, %s1735_s10 }
  0x82   : > { %p1739_p10 = pneg %p1738_p5  ;;  %p1745_p13 = por %p1744_p7, %p1743_p9 }
  0x84   : > { %p1746_p4 = pnand %p1745_p13, %p1739_p10 }
  0x86   : > { %1749 = shalt.err (!%p1746_p4)
}
  0x87   : > { %s1928_s12 = smov 256   ;;  %s1929_s21 = smov 8  }
  0x88   : > { %s4718_s0 = smov 128   ;;  %p4719_p0 = scmp.ne.s32.totalorder %s4703_s13, 0 }
  0x89   : > { %1527 = dma.hbm_to_vmem [thread:$0]  (!%p4717_p12), %s2192_s1, 512, %s2203_s30, %s2216_s16, %s1928_s12, %s4718_s0, %s1929_s21  }
  0x8a   : > { %264 = sbr.rel (%p4719_p0) target bundleno = 651 (0x28b), region = 36  ;;  %p4720_p11 = scmp.ne.s32.totalorder (!%p4719_p0), %s4694_s8, 0 }
  0x91   : > { %1843 = dma.done.wait (%p4720_p11), [#allocation6], 16  }
  0x92   : > { %1845 = vsyncadd (%p4720_p11), [#allocation6], 4294967280  ;;  %s270_s26 = sand.u32 1, %s1888_s22   ;;  %p4721_p1 = scmp.ne.s32.totalorder %s4696_s11, 0 }
  0x93   : > { %s2252_s7 = sshll.u32 %s270_s26, 3  ;;  %s271_s9 = scalar_lea.sflag [#allocation4], %s270_s26 }
  0x94   : > { %1847 = dma.done.wait (%p4721_p1), %s271_s9, 128  }
  0x95   : > { %1849 = vsyncadd (%p4721_p1), %s271_s9, 4294967168  ;;  %s279_s13 = sand.u32 1, %s1876_s19   ;;  %p4722_p12 = scmp.ne.s32.totalorder %s4698_s14, 0 }
  0x96   : > { %s1471_s6 = sshll.u32 %s279_s13, 5  ;;  %s280_s30 = scalar_lea.sflag [#allocation9], %s279_s13 }
  0x97   : > { %s2260_s8 = scalar_lea.vmem [#allocation8], %s1471_s6 }
  0x98   : > { %1851 = dma.done.wait (%p4722_p12), %s280_s30, 512  }
  0x99   : > { %1853 = vsyncadd (%p4722_p12), %s280_s30, 4294966784 }
  0x9a   : > { %288 = sfence }
  0x9b   : > { %s4723_s16 = sld [smem:[#allocation16_spill]]  ;;  %s4724_s1 = sld [smem:[#allocation18_spill]] }
  0x9c   : > { %s4725_s15 = sld [smem:[#allocation17_spill]]  ;;  %s4726_s13 = sld [smem:[#allocation28_spill]] }
  0xa1   : > { %s4682_s11 = sand.u32 1, %s4723_s16   ;;  %s2268_s25 = sshll.u32 %s4724_s1, 1 }
  0xa2   : > { %s1472_s4 = sshll.u32 %s4682_s11, 4  ;;  %p326_p8 = scmp.lt.s32.totalorder %s4725_s15, 1 }
  0xa3   : > { %p328_p6 = scmp.lt.s32.totalorder %s2268_s25, 3  ;;  %s2279_s30 = scalar_lea.vmem [#allocation10], %s1472_s4 }
  0xa4   : > { %s327_s12 = scalar_select %p326_p8, %s4725_s15, 1 }
  0xa5   : > { %s329_s21 = scalar_select %p328_p6, %s2268_s25, 3 }
  0xa6   : > { %s1474_s0 = sshll.u32 %s327_s12, 2  ;;  %p1475_p3 = scmp.ne.s32.totalorder %s4725_s15, 0 }
  0xa7   : > { %s331_s14 = sadd.s32 %s1474_s0, %s329_s21  ;;  %v1930_v0 = vmov (!%p1475_p3), 0.0  }
  0xa8   : > { %s332_s6 = scalar_lea.vmem %s4726_s13, %s331_s14  ;;  %340 = sbr.rel (%p1475_p3) target bundleno = 175 (0xaf), region = 52  ;;  %341 = vst [vmem:[#allocation2] sm:$0xff] (!%p1475_p3), %v1930_v0  ;;  %342 = vst [vmem:[#allocation2 + $0x8] sm:$0xff] (!%p1475_p3), %v1930_v0 }
  0xa9   : > { %343 = vst [vmem:[#allocation2 + $0x10] sm:$0xff] (!%p1475_p3), %v1930_v0  ;;  %344 = vst [vmem:[#allocation2 + $0x18] sm:$0xff] (!%p1475_p3), %v1930_v0 }
  0xaf PF: > { %s2282_s16 = sld [smem:[#allocation3 + $0x1]]  ;;  %v361_v1 = vld [vmem:[%s332_s6] sm:$0x3]  ;;  %v367_v2 = vlaneseq  ;;  %s2284_s1 = sld [smem:[#allocation3 + $0x2]]  ;;  %v1931_v3 = vmov 1966171168  }
  0xb0   : > { %s2286_s4 = sld [smem:[#allocation3 + $0x3]]  ;;  %s2288_s12 = sld [smem:[#allocation3 + $0x4]]  ;;  %v365_v4 = vunpack.c.l.s4 %v1931_v3  ;;  %v392_v6 = vld [vmem:[%s2260_s8] sm:$0xff]  ;;  %v362_v7 = vunpack.c.l.bf16 %v361_v1  ;;  %v393_v8 = vld [vmem:[%s2260_s8 + $0x8] sm:$0xff]  ;;  %v2301_v10 = vld [vmem:[%s2260_s8 + $0x10] sm:$0xff] }
  0xb1   : > { %v2290_v5 = vshrl.u32 %v367_v2, 7  ;;  %s2293_s15 = sld [smem:[#allocation3 + $0x5]]  ;;  %s2295_s21 = sld [smem:[#allocation3 + $0x7]]  ;;  %v2298_v9 = vunpack.c.h.b16 %v392_v6  ;;  %v2308_v13 = vunpack.c.h.b16 %v393_v8  ;;  %v2317_v17 = vunpack.c.l.b16 %v392_v6 }
  0xb2   : > { %s2303_s0 = sld [smem:[#allocation3 + $0x8]]  ;;  %s2305_s14 = sld [smem:[#allocation3 + $0x9]]  ;;  %v366_v11 = vunpack.c.0.s8 %v365_v4  ;;  %v2326_v21 = vunpack.c.l.b16 %v393_v8  ;;  %v2342_v25 = vunpack.c.h.b16 %v2301_v10 }
  0xb3   : > { %v378_v12 = vsub.s32 1, %v2290_v5  ;;  %v374_v14 = vsub.s32 0, %v2290_v5  ;;  %s2311_s26 = sld [smem:[#allocation3 + $0xa]]  ;;  %s2313_s9 = sld [smem:[#allocation3 + $0xb]]  ;;  %v405_v15 = vand.u32 1, %v2298_v9  ;;  %v421_v16 = vand.u32 2, %v2298_v9 }
  0xb4   : > { %s2319_s13 = sld [smem:[#allocation3 + $0xc]]  ;;  %s2321_s6 = sld [smem:[#allocation3 + $0xd]]  ;;  %v369_v18 = vsub.s32 %v366_v11, %v2290_v5  ;;  %v407_v19 = vand.u32 1, %v2308_v13  ;;  %v423_v20 = vand.u32 2, %v2308_v13  ;;  %v437_v27 = vand.u32 4, %v2298_v9 }
  0xb5   : > { %s2328_s11 = sld [smem:[#allocation3 + $0xe]]  ;;  %s1490_s10 = sld [smem:[#allocation3 + $0xf]]  ;;  %vm2330_vm0 = vcmp.ne.s32.totalorder %v405_v15, 0  ;;  %vm2334_vm1 = vcmp.ne.s32.totalorder %v421_v16, 0  ;;  %v2339_v24 = vstv %s2282_s16  ;;  %v2353_v29 = vstv %s2284_s1 }
  0xb6   : > { %s2344_s2 = sld [smem:[#allocation3 + $0x6]]  ;;  %v2346_v26 = vrot.slane %v362_v7, %v369_v18  ;;  %v2350_v28 = vstv %s2286_s4  ;;  %vm2355_vm2 = vcmp.ne.s32.totalorder %v407_v19, 0  ;;  %v439_v31 = vand.u32 4, %v2308_v13  ;;  %s2375_s16 = sld [smem:[#allocation3]] }
  0xb7   : > { %v453_v32 = vand.u32 8, %v2298_v9  ;;  %v455_v33 = vand.u32 8, %v2308_v13  ;;  %vm2362_vm3 = vcmp.ne.s32.totalorder %v423_v20, 0  ;;  %v2373_v37 = vstv %s2295_s21 }
  0xb8   : > { %v2367_v35 = vstv %s2305_s14  ;;  %v2370_v36 = vstv %s2303_s0  ;;  %v2380_v38 = vrot.slane %v2346_v26, %v378_v12  ;;  %vm2382_vm4 = vcmp.ne.s32.totalorder %v437_v27, 0 }
  0xb9   : > { %vm2386_vm5 = vcmp.ne.s32.totalorder %v439_v31, 0  ;;  %v2391_v41 = vstv %s2313_s9  ;;  %vm2393_vm6 = vcmp.ne.s32.totalorder %v453_v32, 0  ;;  %vm2397_vm7 = vcmp.ne.s32.totalorder %v455_v33, 0 }
  0xba   : > { %v2402_v44 = vstv %s2321_s6  ;;  %v2405_v45 = vstv %s2319_s13  ;;  %v2408_v46 = vstv %s2311_s26  ;;  %v509_v47 = vsel %vm2330_vm0, %v2367_v35, %v2370_v36 }
  0xbb   : > { %v2414_v48 = vstv %s1490_s10  ;;  %v2417_v49 = vstv %s2328_s11  ;;  %v481_v50 = vsel %vm2330_vm0, %v2402_v44, %v2405_v45  ;;  %v483_v51 = vsel %vm2355_vm2, %v2402_v44, %v2405_v45 }
  0xbc   : > { %v471_v52 = vsel %vm2330_vm0, %v2414_v48, %v2417_v49  ;;  %v473_v53 = vsel %vm2355_vm2, %v2414_v48, %v2417_v49  ;;  %v499_v54 = vsel %vm2330_vm0, %v2391_v41, %v2408_v46  ;;  %v501_v55 = vsel %vm2355_vm2, %v2391_v41, %v2408_v46 }
  0xbd   : > { %v489_v56 = vsel %vm2334_vm1, %v471_v52, %v481_v50  ;;  %v491_v57 = vsel %vm2362_vm3, %v473_v53, %v483_v51  ;;  %v511_v58 = vsel %vm2355_vm2, %v2367_v35, %v2370_v36  ;;  %v517_v59 = vsel %vm2334_vm1, %v499_v54, %v509_v47 }
  0xbe   : > { %v519_v60 = vsel %vm2362_vm3, %v501_v55, %v511_v58  ;;  %v525_v61 = vsel %vm2382_vm4, %v489_v56, %v517_v59  ;;  %v2458_v62 = vstv %s2344_s2  ;;  %v2461_v63 = vstv %s2293_s15  ;;  %s4983_s2 = scalar_lea.vmem [#allocation7], %s2252_s7  ;;  %s4984_s7 = sld [smem:[#allocation17_spill]] }
  0xbf   : > { %v527_v0 = vsel %vm2386_vm5, %v491_v57, %v519_v60  ;;  %v535_v1 = vsel %vm2330_vm0, %v2373_v37, %v2458_v62  ;;  %v537_v2 = vsel %vm2355_vm2, %v2373_v37, %v2458_v62  ;;  %v2474_v3 = vstv %s2288_s12 }
  0xc0   : > { %v545_v4 = vsel %vm2330_vm0, %v2461_v63, %v2474_v3  ;;  %v547_v6 = vsel %vm2355_vm2, %v2461_v63, %v2474_v3  ;;  %v563_v7 = vsel %vm2330_vm0, %v2350_v28, %v2353_v29  ;;  %v565_v8 = vsel %vm2355_vm2, %v2350_v28, %v2353_v29 }
  0xc1   : > { %v553_v11 = vsel %vm2334_vm1, %v535_v1, %v545_v4  ;;  %v555_v15 = vsel %vm2362_vm3, %v537_v2, %v547_v6  ;;  %v2497_v16 = vstv %s2375_s16  ;;  %v2502_v18 = vrot.slane %v2346_v26, %v374_v14 }
  0xc2   : > { %v573_v19 = vsel %vm2330_vm0, %v2339_v24, %v2497_v16  ;;  %v575_v20 = vsel %vm2355_vm2, %v2339_v24, %v2497_v16  ;;  %v404_v27 = vand.u32 1, %v2317_v17  ;;  %v406_v31 = vand.u32 1, %v2326_v21 }
  0xc3   : > { %v581_v32 = vsel %vm2334_vm1, %v563_v7, %v573_v19  ;;  %v583_v33 = vsel %vm2362_vm3, %v565_v8, %v575_v20  ;;  %v420_v47 = vand.u32 2, %v2317_v17  ;;  %v422_v22 = vand.u32 2, %v2326_v21 }
  0xc4   : > { %v589_v50 = vsel %vm2382_vm4, %v553_v11, %v581_v32  ;;  %v591_v30 = vsel %vm2386_vm5, %v555_v15, %v583_v33  ;;  %vm2524_vm8 = vcmp.ne.s32.totalorder %v404_v27, 0  ;;  %vm2528_vm9 = vcmp.ne.s32.totalorder %v406_v31, 0  ;;  %v2613_v32 = vld [vmem:[%s2260_s8 + $0x18] sm:$0xff]  ;;  %p1492_p2 = scmp.ne.s32.totalorder %s4984_s7, 1 }
  0xc5   : > { %v597_v34 = vsel %vm2393_vm6, %v525_v61, %v589_v50  ;;  %v599_v52 = vsel %vm2397_vm7, %v527_v0, %v591_v30  ;;  %vm2536_vm10 = vcmp.ne.s32.totalorder %v420_v47, 0  ;;  %vm2540_vm11 = vcmp.ne.s32.totalorder %v422_v22, 0 }
  0xc6   : > { %v605_v53 = vmul.f32 %v597_v34, %v2380_v38  ;;  %v607_v54 = vmul.f32 %v599_v52, %v2380_v38  ;;  %v436_v55 = vand.u32 4, %v2317_v17  ;;  %v438_v42 = vand.u32 4, %v2326_v21 }
  0xc7   : > { %v452_v56 = vand.u32 8, %v2317_v17  ;;  %v454_v43 = vand.u32 8, %v2326_v21  ;;  %v470_v57 = vsel %vm2524_vm8, %v2414_v48, %v2417_v49  ;;  %v472_v58 = vsel %vm2528_vm9, %v2414_v48, %v2417_v49 }
  0xc8   : > { %v613_v59 = vpack.c.bf16 %v607_v54, %v605_v53  ;;  %vm2558_vm12 = vcmp.ne.s32.totalorder %v436_v55, 0  ;;  %vm2562_vm13 = vcmp.ne.s32.totalorder %v438_v42, 0  ;;  %v480_v0 = vsel %vm2524_vm8, %v2402_v44, %v2405_v45 }
  0xc9   : > { %vm2570_vm14 = vcmp.ne.s32.totalorder %v452_v56, 0  ;;  %vm2574_vm15 = vcmp.ne.s32.totalorder %v454_v43, 0  ;;  %v482_v4 = vsel %vm2528_vm9, %v2402_v44, %v2405_v45  ;;  %v488_v6 = vsel %vm2536_vm10, %v470_v57, %v480_v0 }
  0xca   : > { %1216 = vmatprep.subr.bf16.mxu0 %v613_v59  ;;  %v490_v7 = vsel %vm2540_vm11, %v472_v58, %v482_v4  ;;  %v498_v8 = vsel %vm2524_vm8, %v2391_v41, %v2408_v46  ;;  %v500_v11 = vsel %vm2528_vm9, %v2391_v41, %v2408_v46  ;;  %v508_v15 = vsel %vm2524_vm8, %v2367_v35, %v2370_v36 }
  0xcb   : > { %v510_v19 = vsel %vm2528_vm9, %v2367_v35, %v2370_v36  ;;  %v516_v20 = vsel %vm2536_vm10, %v498_v8, %v508_v15  ;;  %v534_v27 = vsel %vm2524_vm8, %v2373_v37, %v2458_v62  ;;  %v536_v31 = vsel %vm2528_vm9, %v2373_v37, %v2458_v62 }
  0xcc   : > { %v518_v33 = vsel %vm2540_vm11, %v500_v11, %v510_v19  ;;  %v524_v47 = vsel %vm2558_vm12, %v488_v6, %v516_v20  ;;  %v544_v22 = vsel %vm2524_vm8, %v2461_v63, %v2474_v3  ;;  %v546_v50 = vsel %vm2528_vm9, %v2461_v63, %v2474_v3 }
  0xcd   : > { %v526_v30 = vsel %vm2562_vm13, %v490_v7, %v518_v33  ;;  %v552_v34 = vsel %vm2536_vm10, %v534_v27, %v544_v22  ;;  %v554_v52 = vsel %vm2540_vm11, %v536_v31, %v546_v50  ;;  %v562_v53 = vsel %vm2524_vm8, %v2350_v28, %v2353_v29 }
  0xce   : > { %v564_v54 = vsel %vm2528_vm9, %v2350_v28, %v2353_v29  ;;  %v572_v55 = vsel %vm2524_vm8, %v2339_v24, %v2497_v16  ;;  %v574_v42 = vsel %vm2528_vm9, %v2339_v24, %v2497_v16  ;;  %v2650_v56 = vunpack.c.h.b16 %v2613_v32 }
  0xcf   : > { %v580_v43 = vsel %vm2536_vm10, %v562_v53, %v572_v55  ;;  %v582_v57 = vsel %vm2540_vm11, %v564_v54, %v574_v42  ;;  %v409_v58 = vand.u32 1, %v2342_v25  ;;  %v425_v59 = vand.u32 2, %v2342_v25 }
  0xd0   : > { %v588_v51 = vsel %vm2558_vm12, %v552_v34, %v580_v43  ;;  %v590_v23 = vsel %vm2562_vm13, %v554_v52, %v582_v57  ;;  %v411_v0 = vand.u32 1, %v2650_v56  ;;  %v427_v4 = vand.u32 2, %v2650_v56 }
  0xd1   : > { %v596_v39 = vsel %vm2570_vm14, %v524_v47, %v588_v51  ;;  %v598_v40 = vsel %vm2574_vm15, %v526_v30, %v590_v23  ;;  %vm2668_vm0 = vcmp.ne.s32.totalorder %v409_v58, 0  ;;  %vm2672_vm1 = vcmp.ne.s32.totalorder %v425_v59, 0 }
  0xd2   : > { %v604_v61 = vmul.f32 %v596_v39, %v2502_v18  ;;  %v606_v7 = vmul.f32 %v598_v40, %v2502_v18  ;;  %vm2678_vm2 = vcmp.ne.s32.totalorder %v411_v0, 0  ;;  %vm2682_vm3 = vcmp.ne.s32.totalorder %v427_v4, 0 }
  0xd3   : > { %v441_v2 = vand.u32 4, %v2342_v25  ;;  %v443_v11 = vand.u32 4, %v2650_v56  ;;  %v457_v15 = vand.u32 8, %v2342_v25  ;;  %v459_v19 = vand.u32 8, %v2650_v56 }
  0xd4   : > { %v612_v20 = vpack.c.bf16 %v606_v7, %v604_v61  ;;  %v475_v27 = vsel %vm2668_vm0, %v2414_v48, %v2417_v49  ;;  %v477_v31 = vsel %vm2678_vm2, %v2414_v48, %v2417_v49  ;;  %v485_v33 = vsel %vm2668_vm0, %v2402_v44, %v2405_v45 }
  0xd5   : > { %vm2702_vm4 = vcmp.ne.s32.totalorder %v441_v2, 0  ;;  %vm2706_vm5 = vcmp.ne.s32.totalorder %v443_v11, 0  ;;  %vm2710_vm6 = vcmp.ne.s32.totalorder %v457_v15, 0  ;;  %vm2714_vm7 = vcmp.ne.s32.totalorder %v459_v19, 0 }
  0xd6   : > { %1217 = vmatpush1.bf16.msra.mxu0 %v612_v20  ;;  %v487_v34 = vsel %vm2678_vm2, %v2402_v44, %v2405_v45  ;;  %v493_v52 = vsel %vm2672_vm1, %v475_v27, %v485_v33  ;;  %v503_v53 = vsel %vm2668_vm0, %v2391_v41, %v2408_v46  ;;  %v505_v54 = vsel %vm2678_vm2, %v2391_v41, %v2408_v46 }
  0xd7   : > { %v495_v55 = vsel %vm2682_vm3, %v477_v31, %v487_v34  ;;  %v513_v42 = vsel %vm2668_vm0, %v2367_v35, %v2370_v36  ;;  %v515_v43 = vsel %vm2678_vm2, %v2367_v35, %v2370_v36  ;;  %v539_v57 = vsel %vm2668_vm0, %v2373_v37, %v2458_v62 }
  0xd8   : > { %v521_v58 = vsel %vm2672_vm1, %v503_v53, %v513_v42  ;;  %v523_v59 = vsel %vm2682_vm3, %v505_v54, %v515_v43  ;;  %v541_v51 = vsel %vm2678_vm2, %v2373_v37, %v2458_v62  ;;  %v549_v23 = vsel %vm2668_vm0, %v2461_v63, %v2474_v3 }
  0xd9   : > { %v529_v0 = vsel %vm2702_vm4, %v493_v52, %v521_v58  ;;  %v531_v4 = vsel %vm2706_vm5, %v495_v55, %v523_v59  ;;  %v551_v39 = vsel %vm2678_vm2, %v2461_v63, %v2474_v3  ;;  %v557_v40 = vsel %vm2672_vm1, %v539_v57, %v549_v23 }
  0xda   : > { %v559_v61 = vsel %vm2682_vm3, %v541_v51, %v551_v39  ;;  %v567_v7 = vsel %vm2668_vm0, %v2350_v28, %v2353_v29  ;;  %v569_v2 = vsel %vm2678_vm2, %v2350_v28, %v2353_v29  ;;  %v577_v11 = vsel %vm2668_vm0, %v2339_v24, %v2497_v16 }
  0xdb   : > { %v579_v15 = vsel %vm2678_vm2, %v2339_v24, %v2497_v16  ;;  %v585_v19 = vsel %vm2672_vm1, %v567_v7, %v577_v11  ;;  %v2789_v20 = vunpack.c.l.b16 %v2301_v10  ;;  %v2792_v27 = vunpack.c.l.b16 %v2613_v32 }
  0xdc   : > { %v587_v31 = vsel %vm2682_vm3, %v569_v2, %v579_v15  ;;  %v593_v6 = vsel %vm2702_vm4, %v557_v40, %v585_v19  ;;  %v617_v33 = vand.u32 16, %v2298_v9  ;;  %v619_v8 = vand.u32 16, %v2308_v13 }
  0xdd   : > { %v595_v60 = vsel %vm2706_vm5, %v559_v61, %v587_v31  ;;  %v601_v10 = vsel %vm2710_vm6, %v529_v0, %v593_v6  ;;  %v408_v34 = vand.u32 1, %v2789_v20  ;;  %v410_v32 = vand.u32 1, %v2792_v27 }
  0xde   : > { %v603_v1 = vsel %vm2714_vm7, %v531_v4, %v595_v60  ;;  %v609_v47 = vmul.f32 %v601_v10, %v2380_v38  ;;  %v424_v52 = vand.u32 2, %v2789_v20  ;;  %v426_v53 = vand.u32 2, %v2792_v27 }
  0xdf   : > { %v611_v54 = vmul.f32 %v603_v1, %v2380_v38  ;;  %vm2812_vm8 = vcmp.ne.s32.totalorder %v408_v34, 0  ;;  %vm2816_vm9 = vcmp.ne.s32.totalorder %v410_v32, 0  ;;  %v440_v55 = vand.u32 4, %v2789_v20 }
  0xe0   : > { %vm2821_vm10 = vcmp.ne.s32.totalorder %v424_v52, 0  ;;  %vm2825_vm11 = vcmp.ne.s32.totalorder %v426_v53, 0  ;;  %v442_v43 = vand.u32 4, %v2792_v27  ;;  %v456_v57 = vand.u32 8, %v2789_v20 }
  0xe1   : > { %v615_v58 = vpack.c.bf16 %v611_v54, %v609_v47  ;;  %vm2831_vm12 = vcmp.ne.s32.totalorder %v440_v55, 0  ;;  %v458_v51 = vand.u32 8, %v2792_v27  ;;  %v474_v23 = vsel %vm2812_vm8, %v2414_v48, %v2417_v49 }
  0xe2   : > { %vm2840_vm13 = vcmp.ne.s32.totalorder %v442_v43, 0  ;;  %vm2844_vm14 = vcmp.ne.s32.totalorder %v456_v57, 0  ;;  %v476_v39 = vsel %vm2816_vm9, %v2414_v48, %v2417_v49  ;;  %v484_v40 = vsel %vm2812_vm8, %v2402_v44, %v2405_v45 }
  0xe3   : > { %1218 = vmatprep.subr.bf16.mxu0 %v615_v58  ;;  %vm2856_vm15 = vcmp.ne.s32.totalorder %v458_v51, 0  ;;  %v486_v7 = vsel %vm2816_vm9, %v2402_v44, %v2405_v45  ;;  %v492_v2 = vsel %vm2821_vm10, %v474_v23, %v484_v40  ;;  %v502_v11 = vsel %vm2812_vm8, %v2391_v41, %v2408_v46 }
  0xe4   : > { %v494_v15 = vsel %vm2825_vm11, %v476_v39, %v486_v7  ;;  %v504_v19 = vsel %vm2816_vm9, %v2391_v41, %v2408_v46  ;;  %v512_v31 = vsel %vm2812_vm8, %v2367_v35, %v2370_v36  ;;  %v514_v6 = vsel %vm2816_vm9, %v2367_v35, %v2370_v36 }
  0xe5   : > { %v520_v60 = vsel %vm2821_vm10, %v502_v11, %v512_v31  ;;  %v522_v10 = vsel %vm2825_vm11, %v504_v19, %v514_v6  ;;  %v538_v34 = vsel %vm2812_vm8, %v2373_v37, %v2458_v62  ;;  %v540_v32 = vsel %vm2816_vm9, %v2373_v37, %v2458_v62 }
  0xe6   : > { %v528_v1 = vsel %vm2831_vm12, %v492_v2, %v520_v60  ;;  %v530_v47 = vsel %vm2840_vm13, %v494_v15, %v522_v10  ;;  %v548_v52 = vsel %vm2812_vm8, %v2461_v63, %v2474_v3  ;;  %v550_v53 = vsel %vm2816_vm9, %v2461_v63, %v2474_v3 }
  0xe7   : > { %v556_v54 = vsel %vm2821_vm10, %v538_v34, %v548_v52  ;;  %v558_v55 = vsel %vm2825_vm11, %v540_v32, %v550_v53  ;;  %v566_v43 = vsel %vm2812_vm8, %v2350_v28, %v2353_v29  ;;  %v568_v57 = vsel %vm2816_vm9, %v2350_v28, %v2353_v29 }
  0xe8   : > { %v576_v58 = vsel %vm2812_vm8, %v2339_v24, %v2497_v16  ;;  %v578_v51 = vsel %vm2816_vm9, %v2339_v24, %v2497_v16  ;;  %vm2928_vm0 = vcmp.ne.s32.totalorder %v617_v33, 0  ;;  %vm2932_vm1 = vcmp.ne.s32.totalorder %v619_v8, 0 }
  0xe9   : > { %v584_v40 = vsel %vm2821_vm10, %v566_v43, %v576_v58  ;;  %v586_v22 = vsel %vm2825_vm11, %v568_v57, %v578_v51  ;;  %v633_v7 = vand.u32 32, %v2298_v9  ;;  %v635_v2 = vand.u32 32, %v2308_v13 }
  0xea   : > { %v592_v33 = vsel %vm2831_vm12, %v556_v54, %v584_v40  ;;  %v594_v50 = vsel %vm2840_vm13, %v558_v55, %v586_v22  ;;  %v649_v8 = vand.u32 64, %v2298_v9  ;;  %v651_v11 = vand.u32 64, %v2308_v13 }
  0xeb   : > { %v600_v30 = vsel %vm2844_vm14, %v528_v1, %v592_v33  ;;  %v602_v42 = vsel %vm2856_vm15, %v530_v47, %v594_v50  ;;  %vm2952_vm2 = vcmp.ne.s32.totalorder %v633_v7, 0  ;;  %vm2956_vm3 = vcmp.ne.s32.totalorder %v635_v2, 0 }
  0xec   : > { %v608_v0 = vmul.f32 %v600_v30, %v2502_v18  ;;  %v610_v19 = vmul.f32 %v602_v42, %v2502_v18  ;;  %vm2962_vm4 = vcmp.ne.s32.totalorder %v649_v8, 0  ;;  %vm2966_vm5 = vcmp.ne.s32.totalorder %v651_v11, 0 }
  0xed   : > { %v665_v61 = vand.u32 128, %v2298_v9  ;;  %v667_v6 = vand.u32 128, %v2308_v13  ;;  %v681_v60 = vsel %vm2928_vm0, %v2414_v48, %v2417_v49  ;;  %v683_v10 = vsel %vm2932_vm1, %v2414_v48, %v2417_v49 }
  0xee   : > { %v614_v34 = vpack.c.bf16 %v610_v19, %v608_v0  ;;  %v689_v32 = vsel %vm2928_vm0, %v2402_v44, %v2405_v45  ;;  %v691_v1 = vsel %vm2932_vm1, %v2402_v44, %v2405_v45  ;;  %v705_v47 = vsel %vm2928_vm0, %v2391_v41, %v2408_v46 }
  0xef   : > { %vm2992_vm6 = vcmp.ne.s32.totalorder %v665_v61, 0  ;;  %vm2996_vm7 = vcmp.ne.s32.totalorder %v667_v6, 0  ;;  %v697_v54 = vsel %vm2952_vm2, %v681_v60, %v689_v32  ;;  %v699_v55 = vsel %vm2956_vm3, %v683_v10, %v691_v1 }
  0xf0   : > { %1219 = vmatpush1.bf16.msra.mxu0 %v614_v34  ;;  %v707_v43 = vsel %vm2932_vm1, %v2391_v41, %v2408_v46  ;;  %v713_v57 = vsel %vm2928_vm0, %v2367_v35, %v2370_v36  ;;  %v715_v58 = vsel %vm2932_vm1, %v2367_v35, %v2370_v36  ;;  %v737_v51 = vsel %vm2928_vm0, %v2373_v37, %v2458_v62 }
  0xf1   : > { %v721_v40 = vsel %vm2952_vm2, %v705_v47, %v713_v57  ;;  %v723_v22 = vsel %vm2956_vm3, %v707_v43, %v715_v58  ;;  %v739_v7 = vsel %vm2932_vm1, %v2373_v37, %v2458_v62  ;;  %v745_v2 = vsel %vm2928_vm0, %v2461_v63, %v2474_v3 }
  0xf2   : > { %v729_v33 = vsel %vm2962_vm4, %v697_v54, %v721_v40  ;;  %v731_v50 = vsel %vm2966_vm5, %v699_v55, %v723_v22  ;;  %v747_v8 = vsel %vm2932_vm1, %v2461_v63, %v2474_v3  ;;  %v753_v11 = vsel %vm2952_vm2, %v737_v51, %v745_v2 }
  0xf3   : > { %v755_v30 = vsel %vm2956_vm3, %v739_v7, %v747_v8  ;;  %v761_v42 = vsel %vm2928_vm0, %v2350_v28, %v2353_v29  ;;  %v763_v0 = vsel %vm2932_vm1, %v2350_v28, %v2353_v29  ;;  %v769_v19 = vsel %vm2928_vm0, %v2339_v24, %v2497_v16 }
  0xf4   : > { %v771_v61 = vsel %vm2932_vm1, %v2339_v24, %v2497_v16  ;;  %v777_v6 = vsel %vm2952_vm2, %v761_v42, %v769_v19  ;;  %v616_v60 = vand.u32 16, %v2317_v17  ;;  %v618_v10 = vand.u32 16, %v2326_v21 }
  0xf5   : > { %v779_v34 = vsel %vm2956_vm3, %v763_v0, %v771_v61  ;;  %v785_v32 = vsel %vm2962_vm4, %v753_v11, %v777_v6  ;;  %v632_v23 = vand.u32 32, %v2317_v17  ;;  %v634_v1 = vand.u32 32, %v2326_v21 }
  0xf6   : > { %v787_v39 = vsel %vm2966_vm5, %v755_v30, %v779_v34  ;;  %v793_v15 = vsel %vm2992_vm6, %v729_v33, %v785_v32  ;;  %vm3074_vm8 = vcmp.ne.s32.totalorder %v616_v60, 0  ;;  %vm3078_vm9 = vcmp.ne.s32.totalorder %v618_v10, 0 }
  0xf7   : > { %v795_v31 = vsel %vm2996_vm7, %v731_v50, %v787_v39  ;;  %v801_v54 = vmul.f32 %v793_v15, %v2380_v38  ;;  %vm3085_vm10 = vcmp.ne.s32.totalorder %v632_v23, 0  ;;  %vm3089_vm11 = vcmp.ne.s32.totalorder %v634_v1, 0 }
  0xf8   : > { %v803_v52 = vmul.f32 %v795_v31, %v2380_v38  ;;  %v648_v43 = vand.u32 64, %v2317_v17  ;;  %v650_v57 = vand.u32 64, %v2326_v21  ;;  %v664_v58 = vand.u32 128, %v2317_v17 }
  0xf9   : > { %v666_v53 = vand.u32 128, %v2326_v21  ;;  %v680_v51 = vsel %vm3074_vm8, %v2414_v48, %v2417_v49  ;;  %v682_v40 = vsel %vm3078_vm9, %v2414_v48, %v2417_v49  ;;  %v688_v22 = vsel %vm3074_vm8, %v2402_v44, %v2405_v45 }
  0xfa   : > { %v809_v7 = vpack.c.bf16 %v803_v52, %v801_v54  ;;  %vm3110_vm12 = vcmp.ne.s32.totalorder %v648_v43, 0  ;;  %vm3114_vm13 = vcmp.ne.s32.totalorder %v650_v57, 0  ;;  %vm3118_vm14 = vcmp.ne.s32.totalorder %v664_v58, 0 }
  0xfb   : > { %vm3122_vm15 = vcmp.ne.s32.totalorder %v666_v53, 0  ;;  %v690_v11 = vsel %vm3078_vm9, %v2402_v44, %v2405_v45  ;;  %v696_v30 = vsel %vm3085_vm10, %v680_v51, %v688_v22  ;;  %v704_v42 = vsel %vm3074_vm8, %v2391_v41, %v2408_v46 }
  0xfc   : > { %1220 = vmatprep.subr.bf16.mxu0 %v809_v7  ;;  %v698_v0 = vsel %vm3089_vm11, %v682_v40, %v690_v11  ;;  %v706_v19 = vsel %vm3078_vm9, %v2391_v41, %v2408_v46  ;;  %v712_v61 = vsel %vm3074_vm8, %v2367_v35, %v2370_v36  ;;  %v714_v6 = vsel %vm3078_vm9, %v2367_v35, %v2370_v36 }
  0xfd   : > { %v720_v60 = vsel %vm3085_vm10, %v704_v42, %v712_v61  ;;  %v722_v10 = vsel %vm3089_vm11, %v706_v19, %v714_v6  ;;  %v736_v34 = vsel %vm3074_vm8, %v2373_v37, %v2458_v62  ;;  %v738_v32 = vsel %vm3078_vm9, %v2373_v37, %v2458_v62 }
  0xfe   : > { %v728_v23 = vsel %vm3110_vm12, %v696_v30, %v720_v60  ;;  %v730_v1 = vsel %vm3114_vm13, %v698_v0, %v722_v10  ;;  %v744_v39 = vsel %vm3074_vm8, %v2461_v63, %v2474_v3  ;;  %v746_v15 = vsel %vm3078_vm9, %v2461_v63, %v2474_v3 }
  0xff   : > { %v752_v31 = vsel %vm3085_vm10, %v736_v34, %v744_v39  ;;  %v754_v54 = vsel %vm3089_vm11, %v738_v32, %v746_v15  ;;  %v760_v52 = vsel %vm3074_vm8, %v2350_v28, %v2353_v29  ;;  %v762_v43 = vsel %vm3078_vm9, %v2350_v28, %v2353_v29 }
 0x100   : > { %v768_v57 = vsel %vm3074_vm8, %v2339_v24, %v2497_v16  ;;  %v770_v58 = vsel %vm3078_vm9, %v2339_v24, %v2497_v16  ;;  %v621_v53 = vand.u32 16, %v2342_v25  ;;  %v623_v51 = vand.u32 16, %v2650_v56 }
 0x101   : > { %v776_v40 = vsel %vm3085_vm10, %v760_v52, %v768_v57  ;;  %v778_v22 = vsel %vm3089_vm11, %v762_v43, %v770_v58  ;;  %v637_v7 = vand.u32 32, %v2342_v25  ;;  %v639_v47 = vand.u32 32, %v2650_v56 }
 0x102   : > { %v784_v11 = vsel %vm3110_vm12, %v752_v31, %v776_v40  ;;  %v786_v59 = vsel %vm3114_vm13, %v754_v54, %v778_v22  ;;  %vm3206_vm0 = vcmp.ne.s32.totalorder %v621_v53, 0  ;;  %vm3210_vm1 = vcmp.ne.s32.totalorder %v623_v51, 0 }
 0x103   : > { %v792_v4 = vsel %vm3118_vm14, %v728_v23, %v784_v11  ;;  %v794_v42 = vsel %vm3122_vm15, %v730_v1, %v786_v59  ;;  %vm3218_vm2 = vcmp.ne.s32.totalorder %v637_v7, 0  ;;  %vm3222_vm3 = vcmp.ne.s32.totalorder %v639_v47, 0 }
 0x104   : > { %v800_v0 = vmul.f32 %v792_v4, %v2502_v18  ;;  %v802_v19 = vmul.f32 %v794_v42, %v2502_v18  ;;  %v653_v61 = vand.u32 64, %v2342_v25  ;;  %v655_v50 = vand.u32 64, %v2650_v56 }
 0x105   : > { %v669_v6 = vand.u32 128, %v2342_v25  ;;  %v671_v8 = vand.u32 128, %v2650_v56  ;;  %v685_v60 = vsel %vm3206_vm0, %v2414_v48, %v2417_v49  ;;  %v687_v10 = vsel %vm3210_vm1, %v2414_v48, %v2417_v49 }
 0x106   : > { %v808_v34 = vpack.c.bf16 %v802_v19, %v800_v0  ;;  %vm3240_vm4 = vcmp.ne.s32.totalorder %v653_v61, 0  ;;  %vm3244_vm5 = vcmp.ne.s32.totalorder %v655_v50, 0  ;;  %v693_v1 = vsel %vm3206_vm0, %v2402_v44, %v2405_v45 }
 0x107   : > { %vm3252_vm6 = vcmp.ne.s32.totalorder %v669_v6, 0  ;;  %vm3256_vm7 = vcmp.ne.s32.totalorder %v671_v8, 0  ;;  %v695_v31 = vsel %vm3210_vm1, %v2402_v44, %v2405_v45  ;;  %v701_v54 = vsel %vm3218_vm2, %v685_v60, %v693_v1 }
 0x108   : > { %1221 = vmatpush1.bf16.msra.mxu0 %v808_v34  ;;  %v703_v52 = vsel %vm3222_vm3, %v687_v10, %v695_v31  ;;  %v709_v43 = vsel %vm3206_vm0, %v2391_v41, %v2408_v46  ;;  %v711_v57 = vsel %vm3210_vm1, %v2391_v41, %v2408_v46  ;;  %v717_v58 = vsel %vm3206_vm0, %v2367_v35, %v2370_v36 }
 0x109   : > { %v719_v53 = vsel %vm3210_vm1, %v2367_v35, %v2370_v36  ;;  %v725_v51 = vsel %vm3218_vm2, %v709_v43, %v717_v58  ;;  %v741_v40 = vsel %vm3206_vm0, %v2373_v37, %v2458_v62  ;;  %v743_v22 = vsel %vm3210_vm1, %v2373_v37, %v2458_v62 }
 0x10a   : > { %v727_v7 = vsel %vm3222_vm3, %v711_v57, %v719_v53  ;;  %v733_v47 = vsel %vm3240_vm4, %v701_v54, %v725_v51  ;;  %v749_v11 = vsel %vm3206_vm0, %v2461_v63, %v2474_v3  ;;  %v751_v59 = vsel %vm3210_vm1, %v2461_v63, %v2474_v3 }
 0x10b   : > { %v735_v4 = vsel %vm3244_vm5, %v703_v52, %v727_v7  ;;  %v757_v42 = vsel %vm3218_vm2, %v741_v40, %v749_v11  ;;  %v759_v0 = vsel %vm3222_vm3, %v743_v22, %v751_v59  ;;  %v765_v19 = vsel %vm3206_vm0, %v2350_v28, %v2353_v29 }
 0x10c   : > { %v767_v61 = vsel %vm3210_vm1, %v2350_v28, %v2353_v29  ;;  %v773_v50 = vsel %vm3206_vm0, %v2339_v24, %v2497_v16  ;;  %v775_v6 = vsel %vm3210_vm1, %v2339_v24, %v2497_v16  ;;  %v620_v8 = vand.u32 16, %v2789_v20 }
 0x10d   : > { %v781_v60 = vsel %vm3218_vm2, %v765_v19, %v773_v50  ;;  %v783_v10 = vsel %vm3222_vm3, %v767_v61, %v775_v6  ;;  %v622_v34 = vand.u32 16, %v2792_v27  ;;  %v636_v1 = vand.u32 32, %v2789_v20 }
 0x10e   : > { %v789_v30 = vsel %vm3240_vm4, %v757_v42, %v781_v60  ;;  %v791_v31 = vsel %vm3244_vm5, %v759_v0, %v783_v10  ;;  %vm3339_vm8 = vcmp.ne.s32.totalorder %v620_v8, 0  ;;  %v638_v2 = vand.u32 32, %v2792_v27 }
 0x10f   : > { %v797_v33 = vsel %vm3252_vm6, %v733_v47, %v789_v30  ;;  %v799_v54 = vsel %vm3256_vm7, %v735_v4, %v791_v31  ;;  %vm3348_vm9 = vcmp.ne.s32.totalorder %v622_v34, 0  ;;  %vm3352_vm10 = vcmp.ne.s32.totalorder %v636_v1, 0 }
 0x110   : > { %v805_v23 = vmul.f32 %v797_v33, %v2380_v38  ;;  %v807_v43 = vmul.f32 %v799_v54, %v2380_v38  ;;  %vm3358_vm11 = vcmp.ne.s32.totalorder %v638_v2, 0  ;;  %v652_v39 = vand.u32 64, %v2789_v20 }
 0x111   : > { %v654_v15 = vand.u32 64, %v2792_v27  ;;  %v668_v58 = vand.u32 128, %v2789_v20  ;;  %v670_v53 = vand.u32 128, %v2792_v27  ;;  %v684_v51 = vsel %vm3339_vm8, %v2414_v48, %v2417_v49 }
 0x112   : > { %v811_v40 = vpack.c.bf16 %v807_v43, %v805_v23  ;;  %vm3370_vm12 = vcmp.ne.s32.totalorder %v652_v39, 0  ;;  %v686_v22 = vsel %vm3348_vm9, %v2414_v48, %v2417_v49  ;;  %v692_v7 = vsel %vm3339_vm8, %v2402_v44, %v2405_v45 }
 0x113   : > { %vm3382_vm13 = vcmp.ne.s32.totalorder %v654_v15, 0  ;;  %vm3386_vm14 = vcmp.ne.s32.totalorder %v668_v58, 0  ;;  %vm3390_vm15 = vcmp.ne.s32.totalorder %v670_v53, 0  ;;  %v694_v4 = vsel %vm3348_vm9, %v2402_v44, %v2405_v45 }
 0x114   : > { %1222 = vmatprep.subr.bf16.mxu0 %v811_v40  ;;  %v700_v42 = vsel %vm3352_vm10, %v684_v51, %v692_v7  ;;  %v702_v0 = vsel %vm3358_vm11, %v686_v22, %v694_v4  ;;  %v708_v19 = vsel %vm3339_vm8, %v2391_v41, %v2408_v46  ;;  %v710_v61 = vsel %vm3348_vm9, %v2391_v41, %v2408_v46 }
 0x115   : > { %v716_v50 = vsel %vm3339_vm8, %v2367_v35, %v2370_v36  ;;  %v718_v6 = vsel %vm3348_vm9, %v2367_v35, %v2370_v36  ;;  %v740_v8 = vsel %vm3339_vm8, %v2373_v37, %v2458_v62  ;;  %v742_v60 = vsel %vm3348_vm9, %v2373_v37, %v2458_v62 }
 0x116   : > { %v724_v10 = vsel %vm3352_vm10, %v708_v19, %v716_v50  ;;  %v726_v34 = vsel %vm3358_vm11, %v710_v61, %v718_v6  ;;  %v748_v1 = vsel %vm3339_vm8, %v2461_v63, %v2474_v3  ;;  %v750_v30 = vsel %vm3348_vm9, %v2461_v63, %v2474_v3 }
 0x117   : > { %v732_v31 = vsel %vm3370_vm12, %v700_v42, %v724_v10  ;;  %v734_v2 = vsel %vm3382_vm13, %v702_v0, %v726_v34  ;;  %v756_v33 = vsel %vm3352_vm10, %v740_v8, %v748_v1  ;;  %v758_v54 = vsel %vm3358_vm11, %v742_v60, %v750_v30 }
 0x118   : > { %v764_v23 = vsel %vm3339_vm8, %v2350_v28, %v2353_v29  ;;  %v766_v43 = vsel %vm3348_vm9, %v2350_v28, %v2353_v29  ;;  %v772_v39 = vsel %vm3339_vm8, %v2339_v24, %v2497_v16  ;;  %v774_v15 = vsel %vm3348_vm9, %v2339_v24, %v2497_v16 }
 0x119   : > { %v780_v58 = vsel %vm3352_vm10, %v764_v23, %v772_v39  ;;  %v782_v53 = vsel %vm3358_vm11, %v766_v43, %v774_v15  ;;  %v371_v51 = vcombine.high %v2346_v26, %v2346_v26  ;;  %v813_v40 = vand.u32 256, %v2298_v9 }
 0x11a   : > { %v788_v55 = vsel %vm3370_vm12, %v756_v33, %v780_v58  ;;  %v790_v22 = vsel %vm3382_vm13, %v758_v54, %v782_v53  ;;  %v815_v52 = vand.u32 256, %v2308_v13  ;;  %v829_v7 = vand.u32 512, %v2298_v9 }
 0x11b   : > { %v796_v32 = vsel %vm3386_vm14, %v732_v31, %v788_v55  ;;  %v798_v57 = vsel %vm3390_vm15, %v734_v2, %v790_v22  ;;  %v3481_v26 = vrot.slane %v371_v51, %v378_v12  ;;  %vm3483_vm0 = vcmp.ne.s32.totalorder %v813_v40, 0 }
 0x11c   : > { %v804_v47 = vmul.f32 %v796_v32, %v2502_v18  ;;  %v806_v4 = vmul.f32 %v798_v57, %v2502_v18  ;;  %vm3489_vm1 = vcmp.ne.s32.totalorder %v815_v52, 0  ;;  %v831_v11 = vand.u32 512, %v2308_v13 }
 0x11d   : > { %vm3494_vm2 = vcmp.ne.s32.totalorder %v829_v7, 0  ;;  %v845_v12 = vand.u32 1024, %v2298_v9  ;;  %v847_v0 = vand.u32 1024, %v2308_v13  ;;  %v861_v19 = vand.u32 2048, %v2298_v9 }
 0x11e   : > { %v810_v61 = vpack.c.bf16 %v806_v4, %v804_v47  ;;  %vm3501_vm3 = vcmp.ne.s32.totalorder %v831_v11, 0  ;;  %v863_v18 = vand.u32 2048, %v2308_v13  ;;  %v877_v6 = vsel %vm3483_vm0, %v2414_v48, %v2417_v49 }
 0x11f   : > { %vm3510_vm4 = vcmp.ne.s32.totalorder %v845_v12, 0  ;;  %vm3514_vm5 = vcmp.ne.s32.totalorder %v847_v0, 0  ;;  %vm3518_vm6 = vcmp.ne.s32.totalorder %v861_v19, 0  ;;  %v879_v34 = vsel %vm3489_vm1, %v2414_v48, %v2417_v49 }
 0x120   : > { %1223 = vmatpush1.bf16.msra.mxu0 %v810_v61  ;;  %vm3526_vm7 = vcmp.ne.s32.totalorder %v863_v18, 0  ;;  %v885_v30 = vsel %vm3483_vm0, %v2402_v44, %v2405_v45  ;;  %v887_v31 = vsel %vm3489_vm1, %v2402_v44, %v2405_v45  ;;  %v901_v2 = vsel %vm3483_vm0, %v2391_v41, %v2408_v46 }
 0x121   : > { %v893_v33 = vsel %vm3494_vm2, %v877_v6, %v885_v30  ;;  %v895_v54 = vsel %vm3501_vm3, %v879_v34, %v887_v31  ;;  %v903_v23 = vsel %vm3489_vm1, %v2391_v41, %v2408_v46  ;;  %v909_v43 = vsel %vm3483_vm0, %v2367_v35, %v2370_v36 }
 0x122   : > { %v911_v39 = vsel %vm3489_vm1, %v2367_v35, %v2370_v36  ;;  %v917_v15 = vsel %vm3494_vm2, %v901_v2, %v909_v43  ;;  %v933_v58 = vsel %vm3483_vm0, %v2373_v37, %v2458_v62  ;;  %v935_v53 = vsel %vm3489_vm1, %v2373_v37, %v2458_v62 }
 0x123   : > { %v919_v40 = vsel %vm3501_vm3, %v903_v23, %v911_v39  ;;  %v925_v55 = vsel %vm3510_vm4, %v893_v33, %v917_v15  ;;  %v941_v22 = vsel %vm3483_vm0, %v2461_v63, %v2474_v3  ;;  %v943_v52 = vsel %vm3489_vm1, %v2461_v63, %v2474_v3 }
 0x124   : > { %v927_v7 = vsel %vm3514_vm5, %v895_v54, %v919_v40  ;;  %v949_v32 = vsel %vm3494_vm2, %v933_v58, %v941_v22  ;;  %v951_v57 = vsel %vm3501_vm3, %v935_v53, %v943_v52  ;;  %v957_v47 = vsel %vm3483_vm0, %v2350_v28, %v2353_v29 }
 0x125   : > { %v959_v4 = vsel %vm3489_vm1, %v2350_v28, %v2353_v29  ;;  %v965_v11 = vsel %vm3483_vm0, %v2339_v24, %v2497_v16  ;;  %v967_v12 = vsel %vm3489_vm1, %v2339_v24, %v2497_v16  ;;  %v3604_v0 = vrot.slane %v371_v51, %v374_v14 }
 0x126   : > { %v973_v19 = vsel %vm3494_vm2, %v957_v47, %v965_v11  ;;  %v975_v61 = vsel %vm3501_vm3, %v959_v4, %v967_v12  ;;  %v812_v18 = vand.u32 256, %v2317_v17  ;;  %v814_v38 = vand.u32 256, %v2326_v21 }
 0x127   : > { %v981_v6 = vsel %vm3510_vm4, %v949_v32, %v973_v19  ;;  %v983_v42 = vsel %vm3514_vm5, %v951_v57, %v975_v61  ;;  %v828_v5 = vand.u32 512, %v2317_v17  ;;  %v830_v14 = vand.u32 512, %v2326_v21 }
 0x128   : > { %v989_v51 = vsel %vm3518_vm6, %v925_v55, %v981_v6  ;;  %v991_v59 = vsel %vm3526_vm7, %v927_v7, %v983_v42  ;;  %vm3622_vm8 = vcmp.ne.s32.totalorder %v812_v18, 0  ;;  %vm3626_vm9 = vcmp.ne.s32.totalorder %v814_v38, 0 }
 0x129   : > { %v997_v60 = vmul.f32 %v989_v51, %v3481_v26  ;;  %v999_v34 = vmul.f32 %v991_v59, %v3481_v26  ;;  %vm3632_vm10 = vcmp.ne.s32.totalorder %v828_v5, 0  ;;  %vm3636_vm11 = vcmp.ne.s32.totalorder %v830_v14, 0 }
 0x12a   : > { %v844_v1 = vand.u32 1024, %v2317_v17  ;;  %v846_v31 = vand.u32 1024, %v2326_v21  ;;  %v860_v2 = vand.u32 2048, %v2317_v17  ;;  %v862_v33 = vand.u32 2048, %v2326_v21 }
 0x12b   : > { %v1005_v54 = vpack.c.bf16 %v999_v34, %v997_v60  ;;  %v876_v23 = vsel %vm3622_vm8, %v2414_v48, %v2417_v49  ;;  %v878_v43 = vsel %vm3626_vm9, %v2414_v48, %v2417_v49  ;;  %v884_v39 = vsel %vm3622_vm8, %v2402_v44, %v2405_v45 }
 0x12c   : > { %vm3656_vm12 = vcmp.ne.s32.totalorder %v844_v1, 0  ;;  %vm3660_vm13 = vcmp.ne.s32.totalorder %v846_v31, 0  ;;  %vm3664_vm14 = vcmp.ne.s32.totalorder %v860_v2, 0  ;;  %vm3668_vm15 = vcmp.ne.s32.totalorder %v862_v33, 0 }
 0x12d   : > { %1224 = vmatprep.subr.bf16.mxu0 %v1005_v54  ;;  %v886_v55 = vsel %vm3626_vm9, %v2402_v44, %v2405_v45  ;;  %v892_v22 = vsel %vm3632_vm10, %v876_v23, %v884_v39  ;;  %v900_v52 = vsel %vm3622_vm8, %v2391_v41, %v2408_v46  ;;  %v902_v7 = vsel %vm3626_vm9, %v2391_v41, %v2408_v46 }
 0x12e   : > { %v894_v32 = vsel %vm3636_vm11, %v878_v43, %v886_v55  ;;  %v908_v57 = vsel %vm3622_vm8, %v2367_v35, %v2370_v36  ;;  %v910_v47 = vsel %vm3626_vm9, %v2367_v35, %v2370_v36  ;;  %v932_v4 = vsel %vm3622_vm8, %v2373_v37, %v2458_v62 }
 0x12f   : > { %v916_v11 = vsel %vm3632_vm10, %v900_v52, %v908_v57  ;;  %v918_v12 = vsel %vm3636_vm11, %v902_v7, %v910_v47  ;;  %v934_v19 = vsel %vm3626_vm9, %v2373_v37, %v2458_v62  ;;  %v940_v61 = vsel %vm3622_vm8, %v2461_v63, %v2474_v3 }
 0x130   : > { %v924_v18 = vsel %vm3656_vm12, %v892_v22, %v916_v11  ;;  %v926_v38 = vsel %vm3660_vm13, %v894_v32, %v918_v12  ;;  %v942_v6 = vsel %vm3626_vm9, %v2461_v63, %v2474_v3  ;;  %v948_v42 = vsel %vm3632_vm10, %v932_v4, %v940_v61 }
 0x131   : > { %v950_v5 = vsel %vm3636_vm11, %v934_v19, %v942_v6  ;;  %v956_v14 = vsel %vm3622_vm8, %v2350_v28, %v2353_v29  ;;  %v958_v51 = vsel %vm3626_vm9, %v2350_v28, %v2353_v29  ;;  %v964_v59 = vsel %vm3622_vm8, %v2339_v24, %v2497_v16 }
 0x132   : > { %v966_v60 = vsel %vm3626_vm9, %v2339_v24, %v2497_v16  ;;  %v972_v34 = vsel %vm3632_vm10, %v956_v14, %v964_v59  ;;  %v817_v1 = vand.u32 256, %v2342_v25  ;;  %v819_v31 = vand.u32 256, %v2650_v56 }
 0x133   : > { %v974_v2 = vsel %vm3636_vm11, %v958_v51, %v966_v60  ;;  %v980_v33 = vsel %vm3656_vm12, %v948_v42, %v972_v34  ;;  %v833_v50 = vand.u32 512, %v2342_v25  ;;  %v835_v54 = vand.u32 512, %v2650_v56 }
 0x134   : > { %v982_v8 = vsel %vm3660_vm13, %v950_v5, %v974_v2  ;;  %v988_v30 = vsel %vm3664_vm14, %v924_v18, %v980_v33  ;;  %vm3754_vm0 = vcmp.ne.s32.totalorder %v817_v1, 0  ;;  %vm3758_vm1 = vcmp.ne.s32.totalorder %v819_v31, 0 }
 0x135   : > { %v990_v43 = vsel %vm3668_vm15, %v926_v38, %v982_v8  ;;  %v996_v39 = vmul.f32 %v988_v30, %v3604_v0  ;;  %vm3765_vm2 = vcmp.ne.s32.totalorder %v833_v50, 0  ;;  %vm3769_vm3 = vcmp.ne.s32.totalorder %v835_v54, 0 }
 0x136   : > { %v998_v53 = vmul.f32 %v990_v43, %v3604_v0  ;;  %v849_v55 = vand.u32 1024, %v2342_v25  ;;  %v851_v22 = vand.u32 1024, %v2650_v56  ;;  %v865_v52 = vand.u32 2048, %v2342_v25 }
 0x137   : > { %v867_v40 = vand.u32 2048, %v2650_v56  ;;  %v881_v7 = vsel %vm3754_vm0, %v2414_v48, %v2417_v49  ;;  %v883_v32 = vsel %vm3758_vm1, %v2414_v48, %v2417_v49  ;;  %v889_v57 = vsel %vm3754_vm0, %v2402_v44, %v2405_v45 }
 0x138   : > { %v1004_v47 = vpack.c.bf16 %v998_v53, %v996_v39  ;;  %vm3790_vm4 = vcmp.ne.s32.totalorder %v849_v55, 0  ;;  %vm3794_vm5 = vcmp.ne.s32.totalorder %v851_v22, 0  ;;  %vm3798_vm6 = vcmp.ne.s32.totalorder %v865_v52, 0 }
 0x139   : > { %vm3802_vm7 = vcmp.ne.s32.totalorder %v867_v40, 0  ;;  %v891_v61 = vsel %vm3758_vm1, %v2402_v44, %v2405_v45  ;;  %v897_v18 = vsel %vm3765_vm2, %v881_v7, %v889_v57  ;;  %v905_v38 = vsel %vm3754_vm0, %v2391_v41, %v2408_v46 }
 0x13a   : > { %1225 = vmatpush1.bf16.msra.mxu0 %v1004_v47  ;;  %v899_v6 = vsel %vm3769_vm3, %v883_v32, %v891_v61  ;;  %v907_v42 = vsel %vm3758_vm1, %v2391_v41, %v2408_v46  ;;  %v913_v5 = vsel %vm3754_vm0, %v2367_v35, %v2370_v36  ;;  %v915_v14 = vsel %vm3758_vm1, %v2367_v35, %v2370_v36 }
 0x13b   : > { %v921_v51 = vsel %vm3765_vm2, %v905_v38, %v913_v5  ;;  %v923_v59 = vsel %vm3769_vm3, %v907_v42, %v915_v14  ;;  %v937_v60 = vsel %vm3754_vm0, %v2373_v37, %v2458_v62  ;;  %v939_v34 = vsel %vm3758_vm1, %v2373_v37, %v2458_v62 }
 0x13c   : > { %v929_v1 = vsel %vm3790_vm4, %v897_v18, %v921_v51  ;;  %v931_v31 = vsel %vm3794_vm5, %v899_v6, %v923_v59  ;;  %v945_v2 = vsel %vm3754_vm0, %v2461_v63, %v2474_v3  ;;  %v947_v33 = vsel %vm3758_vm1, %v2461_v63, %v2474_v3 }
 0x13d   : > { %v953_v50 = vsel %vm3765_vm2, %v937_v60, %v945_v2  ;;  %v955_v54 = vsel %vm3769_vm3, %v939_v34, %v947_v33  ;;  %v961_v8 = vsel %vm3754_vm0, %v2350_v28, %v2353_v29  ;;  %v963_v30 = vsel %vm3758_vm1, %v2350_v28, %v2353_v29 }
 0x13e   : > { %v969_v43 = vsel %vm3754_vm0, %v2339_v24, %v2497_v16  ;;  %v971_v39 = vsel %vm3758_vm1, %v2339_v24, %v2497_v16  ;;  %v816_v53 = vand.u32 256, %v2789_v20  ;;  %v818_v55 = vand.u32 256, %v2792_v27 }
 0x13f   : > { %v977_v22 = vsel %vm3765_vm2, %v961_v8, %v969_v43  ;;  %v979_v52 = vsel %vm3769_vm3, %v963_v30, %v971_v39  ;;  %v832_v40 = vand.u32 512, %v2789_v20  ;;  %v834_v23 = vand.u32 512, %v2792_v27 }
 0x140   : > { %v985_v7 = vsel %vm3790_vm4, %v953_v50, %v977_v22  ;;  %v987_v10 = vsel %vm3794_vm5, %v955_v54, %v979_v52  ;;  %vm3886_vm8 = vcmp.ne.s32.totalorder %v816_v53, 0  ;;  %vm3890_vm9 = vcmp.ne.s32.totalorder %v818_v55, 0 }
 0x141   : > { %v993_v58 = vsel %vm3798_vm6, %v929_v1, %v985_v7  ;;  %v995_v57 = vsel %vm3802_vm7, %v931_v31, %v987_v10  ;;  %vm3898_vm10 = vcmp.ne.s32.totalorder %v832_v40, 0  ;;  %vm3902_vm11 = vcmp.ne.s32.totalorder %v834_v23, 0 }
 0x142   : > { %v1001_v11 = vmul.f32 %v993_v58, %v3481_v26  ;;  %v1003_v61 = vmul.f32 %v995_v57, %v3481_v26  ;;  %v848_v18 = vand.u32 1024, %v2789_v20  ;;  %v850_v12 = vand.u32 1024, %v2792_v27 }
 0x143   : > { %v864_v38 = vand.u32 2048, %v2789_v20  ;;  %v866_v19 = vand.u32 2048, %v2792_v27  ;;  %v880_v6 = vsel %vm3886_vm8, %v2414_v48, %v2417_v49  ;;  %v882_v42 = vsel %vm3890_vm9, %v2414_v48, %v2417_v49 }
 0x144   : > { %v1007_v5 = vpack.c.bf16 %v1003_v61, %v1001_v11  ;;  %vm3920_vm12 = vcmp.ne.s32.totalorder %v848_v18, 0  ;;  %vm3924_vm13 = vcmp.ne.s32.totalorder %v850_v12, 0  ;;  %v888_v59 = vsel %vm3886_vm8, %v2402_v44, %v2405_v45 }
 0x145   : > { %vm3932_vm14 = vcmp.ne.s32.totalorder %v864_v38, 0  ;;  %vm3936_vm15 = vcmp.ne.s32.totalorder %v866_v19, 0  ;;  %v890_v1 = vsel %vm3890_vm9, %v2402_v44, %v2405_v45  ;;  %v896_v31 = vsel %vm3898_vm10, %v880_v6, %v888_v59 }
 0x146   : > { %1226 = vmatprep.subr.bf16.mxu0 %v1007_v5  ;;  %v898_v2 = vsel %vm3902_vm11, %v882_v42, %v890_v1  ;;  %v904_v33 = vsel %vm3886_vm8, %v2391_v41, %v2408_v46  ;;  %v906_v50 = vsel %vm3890_vm9, %v2391_v41, %v2408_v46  ;;  %v912_v54 = vsel %vm3886_vm8, %v2367_v35, %v2370_v36 }
 0x147   : > { %v914_v8 = vsel %vm3890_vm9, %v2367_v35, %v2370_v36  ;;  %v920_v30 = vsel %vm3898_vm10, %v904_v33, %v912_v54  ;;  %v936_v43 = vsel %vm3886_vm8, %v2373_v37, %v2458_v62  ;;  %v938_v39 = vsel %vm3890_vm9, %v2373_v37, %v2458_v62 }
 0x148   : > { %v922_v53 = vsel %vm3902_vm11, %v906_v50, %v914_v8  ;;  %v928_v55 = vsel %vm3920_vm12, %v896_v31, %v920_v30  ;;  %v944_v22 = vsel %vm3886_vm8, %v2461_v63, %v2474_v3  ;;  %v946_v52 = vsel %vm3890_vm9, %v2461_v63, %v2474_v3 }
 0x149   : > { %v930_v40 = vsel %vm3924_vm13, %v898_v2, %v922_v53  ;;  %v952_v23 = vsel %vm3898_vm10, %v936_v43, %v944_v22  ;;  %v954_v7 = vsel %vm3902_vm11, %v938_v39, %v946_v52  ;;  %v960_v10 = vsel %vm3886_vm8, %v2350_v28, %v2353_v29 }
 0x14a   : > { %v962_v58 = vsel %vm3890_vm9, %v2350_v28, %v2353_v29  ;;  %v968_v57 = vsel %vm3886_vm8, %v2339_v24, %v2497_v16  ;;  %v970_v11 = vsel %vm3890_vm9, %v2339_v24, %v2497_v16  ;;  %v1009_v61 = vand.u32 4096, %v2298_v9 }
 0x14b   : > { %v976_v18 = vsel %vm3898_vm10, %v960_v10, %v968_v57  ;;  %v978_v12 = vsel %vm3902_vm11, %v962_v58, %v970_v11  ;;  %v1011_v38 = vand.u32 4096, %v2308_v13  ;;  %v1025_v19 = vand.u32 8192, %v2298_v9 }
 0x14c   : > { %v984_v32 = vsel %vm3920_vm12, %v952_v23, %v976_v18  ;;  %v986_v6 = vsel %vm3924_vm13, %v954_v7, %v978_v12  ;;  %vm4019_vm0 = vcmp.ne.s32.totalorder %v1009_v61, 0  ;;  %v1027_v47 = vand.u32 8192, %v2308_v13 }
 0x14d   : > { %v992_v4 = vsel %vm3932_vm14, %v928_v55, %v984_v32  ;;  %v994_v42 = vsel %vm3936_vm15, %v930_v40, %v986_v6  ;;  %vm4028_vm1 = vcmp.ne.s32.totalorder %v1011_v38, 0  ;;  %vm4032_vm2 = vcmp.ne.s32.totalorder %v1025_v19, 0 }
 0x14e   : > { %v1000_v51 = vmul.f32 %v992_v4, %v3604_v0  ;;  %v1002_v59 = vmul.f32 %v994_v42, %v3604_v0  ;;  %vm4038_vm3 = vcmp.ne.s32.totalorder %v1027_v47, 0  ;;  %v1041_v60 = vand.u32 16384, %v2298_v9 }
 0x14f   : > { %v1043_v34 = vand.u32 16384, %v2308_v13  ;;  %v1057_v31 = vand.u32 32768, %v2298_v9  ;;  %v1059_v2 = vand.u32 32768, %v2308_v13  ;;  %v1073_v33 = vsel %vm4019_vm0, %v2414_v48, %v2417_v49 }
 0x150   : > { %v1006_v50 = vpack.c.bf16 %v1002_v59, %v1000_v51  ;;  %vm4050_vm4 = vcmp.ne.s32.totalorder %v1041_v60, 0  ;;  %v1075_v8 = vsel %vm4028_vm1, %v2414_v48, %v2417_v49  ;;  %v1081_v9 = vsel %vm4019_vm0, %v2402_v44, %v2405_v45 }
 0x151   : > { %vm4062_vm5 = vcmp.ne.s32.totalorder %v1043_v34, 0  ;;  %vm4066_vm6 = vcmp.ne.s32.totalorder %v1057_v31, 0  ;;  %vm4070_vm7 = vcmp.ne.s32.totalorder %v1059_v2, 0  ;;  %v1083_v39 = vsel %vm4028_vm1, %v2402_v44, %v2405_v45 }
 0x152   : > { %1227 = vmatpush1.bf16.msra.mxu0 %v1006_v50  ;;  %v1089_v53 = vsel %vm4032_vm2, %v1073_v33, %v1081_v9  ;;  %v1091_v55 = vsel %vm4038_vm3, %v1075_v8, %v1083_v39  ;;  %v1097_v22 = vsel %vm4019_vm0, %v2391_v41, %v2408_v46  ;;  %v1099_v52 = vsel %vm4028_vm1, %v2391_v41, %v2408_v46 }
 0x153   : > { %v1105_v40 = vsel %vm4019_vm0, %v2367_v35, %v2370_v36  ;;  %v1107_v23 = vsel %vm4028_vm1, %v2367_v35, %v2370_v36  ;;  %v1129_v7 = vsel %vm4019_vm0, %v2373_v37, %v2458_v62  ;;  %v1131_v10 = vsel %vm4028_vm1, %v2373_v37, %v2458_v62 }
 0x154   : > { %v1113_v58 = vsel %vm4032_vm2, %v1097_v22, %v1105_v40  ;;  %v1115_v57 = vsel %vm4038_vm3, %v1099_v52, %v1107_v23  ;;  %v1137_v11 = vsel %vm4019_vm0, %v2461_v63, %v2474_v3  ;;  %v1139_v61 = vsel %vm4028_vm1, %v2461_v63, %v2474_v3 }
 0x155   : > { %v1121_v18 = vsel %vm4050_vm4, %v1089_v53, %v1113_v58  ;;  %v1123_v12 = vsel %vm4062_vm5, %v1091_v55, %v1115_v57  ;;  %v1145_v38 = vsel %vm4032_vm2, %v1129_v7, %v1137_v11  ;;  %v1147_v19 = vsel %vm4038_vm3, %v1131_v10, %v1139_v61 }
 0x156   : > { %v1153_v32 = vsel %vm4019_vm0, %v2350_v28, %v2353_v29  ;;  %v1155_v6 = vsel %vm4028_vm1, %v2350_v28, %v2353_v29  ;;  %v1161_v47 = vsel %vm4019_vm0, %v2339_v24, %v2497_v16  ;;  %v1163_v4 = vsel %vm4028_vm1, %v2339_v24, %v2497_v16 }
 0x157   : > { %v1169_v42 = vsel %vm4032_vm2, %v1153_v32, %v1161_v47  ;;  %v1171_v51 = vsel %vm4038_vm3, %v1155_v6, %v1163_v4  ;;  %v1008_v59 = vand.u32 4096, %v2317_v17  ;;  %v1010_v60 = vand.u32 4096, %v2326_v21 }
 0x158   : > { %v1177_v34 = vsel %vm4050_vm4, %v1145_v38, %v1169_v42  ;;  %v1179_v15 = vsel %vm4062_vm5, %v1147_v19, %v1171_v51  ;;  %v1024_v31 = vand.u32 8192, %v2317_v17  ;;  %v1026_v5 = vand.u32 8192, %v2326_v21 }
 0x159   : > { %v1185_v14 = vsel %vm4066_vm6, %v1121_v18, %v1177_v34  ;;  %v1187_v1 = vsel %vm4070_vm7, %v1123_v12, %v1179_v15  ;;  %vm4158_vm8 = vcmp.ne.s32.totalorder %v1008_v59, 0  ;;  %vm4162_vm9 = vcmp.ne.s32.totalorder %v1010_v60, 0 }
 0x15a   : > { %v1193_v50 = vmul.f32 %v1185_v14, %v3481_v26  ;;  %v1195_v54 = vmul.f32 %v1187_v1, %v3481_v26  ;;  %vm4168_vm10 = vcmp.ne.s32.totalorder %v1024_v31, 0  ;;  %vm4172_vm11 = vcmp.ne.s32.totalorder %v1026_v5, 0 }
 0x15b   : > { %v1040_v13 = vand.u32 16384, %v2317_v17  ;;  %v1042_v30 = vand.u32 16384, %v2326_v21  ;;  %v1056_v43 = vand.u32 32768, %v2317_v17  ;;  %v1058_v39 = vand.u32 32768, %v2326_v21 }
 0x15c   : > { %v1201_v53 = vpack.c.bf16 %v1195_v54, %v1193_v50  ;;  %v1072_v55 = vsel %vm4158_vm8, %v2414_v48, %v2417_v49  ;;  %v1074_v22 = vsel %vm4162_vm9, %v2414_v48, %v2417_v49  ;;  %v1080_v52 = vsel %vm4158_vm8, %v2402_v44, %v2405_v45 }
 0x15d   : > { %vm4192_vm12 = vcmp.ne.s32.totalorder %v1040_v13, 0  ;;  %vm4196_vm13 = vcmp.ne.s32.totalorder %v1042_v30, 0  ;;  %vm4200_vm14 = vcmp.ne.s32.totalorder %v1056_v43, 0  ;;  %vm4204_vm15 = vcmp.ne.s32.totalorder %v1058_v39, 0 }
 0x15e   : > { %1228 = vmatprep.subr.bf16.mxu0 %v1201_v53  ;;  %v1082_v7 = vsel %vm4162_vm9, %v2402_v44, %v2405_v45  ;;  %v1088_v10 = vsel %vm4168_vm10, %v1072_v55, %v1080_v52  ;;  %v1096_v58 = vsel %vm4158_vm8, %v2391_v41, %v2408_v46  ;;  %v1098_v57 = vsel %vm4162_vm9, %v2391_v41, %v2408_v46 }
 0x15f   : > { %v1090_v11 = vsel %vm4172_vm11, %v1074_v22, %v1082_v7  ;;  %v1104_v61 = vsel %vm4158_vm8, %v2367_v35, %v2370_v36  ;;  %v1106_v18 = vsel %vm4162_vm9, %v2367_v35, %v2370_v36  ;;  %v1128_v12 = vsel %vm4158_vm8, %v2373_v37, %v2458_v62 }
 0x160   : > { %v1112_v38 = vsel %vm4168_vm10, %v1096_v58, %v1104_v61  ;;  %v1114_v19 = vsel %vm4172_vm11, %v1098_v57, %v1106_v18  ;;  %v1130_v32 = vsel %vm4162_vm9, %v2373_v37, %v2458_v62  ;;  %v1136_v6 = vsel %vm4158_vm8, %v2461_v63, %v2474_v3 }
 0x161   : > { %v1120_v47 = vsel %vm4192_vm12, %v1088_v10, %v1112_v38  ;;  %v1122_v4 = vsel %vm4196_vm13, %v1090_v11, %v1114_v19  ;;  %v1138_v42 = vsel %vm4162_vm9, %v2461_v63, %v2474_v3  ;;  %v1144_v51 = vsel %vm4168_vm10, %v1128_v12, %v1136_v6 }
 0x162   : > { %v1146_v59 = vsel %vm4172_vm11, %v1130_v32, %v1138_v42  ;;  %v1152_v60 = vsel %vm4158_vm8, %v2350_v28, %v2353_v29  ;;  %v1154_v34 = vsel %vm4162_vm9, %v2350_v28, %v2353_v29  ;;  %v1160_v15 = vsel %vm4158_vm8, %v2339_v24, %v2497_v16 }
 0x163   : > { %v1162_v31 = vsel %vm4162_vm9, %v2339_v24, %v2497_v16  ;;  %v1168_v5 = vsel %vm4168_vm10, %v1152_v60, %v1160_v15  ;;  %v1013_v14 = vand.u32 4096, %v2342_v25  ;;  %v1015_v1 = vand.u32 4096, %v2650_v56 }
 0x164   : > { %v1170_v50 = vsel %vm4172_vm11, %v1154_v34, %v1162_v31  ;;  %v1176_v54 = vsel %vm4192_vm12, %v1144_v51, %v1168_v5  ;;  %v1029_v2 = vand.u32 8192, %v2342_v25  ;;  %v1031_v13 = vand.u32 8192, %v2650_v56 }
 0x165   : > { %v1178_v33 = vsel %vm4196_vm13, %v1146_v59, %v1170_v50  ;;  %v1184_v8 = vsel %vm4200_vm14, %v1120_v47, %v1176_v54  ;;  %vm4290_vm0 = vcmp.ne.s32.totalorder %v1013_v14, 0  ;;  %vm4294_vm1 = vcmp.ne.s32.totalorder %v1015_v1, 0 }
 0x166   : > { %v1186_v43 = vsel %vm4204_vm15, %v1122_v4, %v1178_v33  ;;  %v1192_v39 = vmul.f32 %v1184_v8, %v3604_v0  ;;  %vm4301_vm2 = vcmp.ne.s32.totalorder %v1029_v2, 0  ;;  %vm4305_vm3 = vcmp.ne.s32.totalorder %v1031_v13, 0 }
 0x167   : > { %v1194_v22 = vmul.f32 %v1186_v43, %v3604_v0  ;;  %v1045_v52 = vand.u32 16384, %v2342_v25  ;;  %v1047_v17 = vand.u32 16384, %v2650_v56  ;;  %v1061_v21 = vand.u32 32768, %v2342_v25 }
 0x168   : > { %v1063_v40 = vand.u32 32768, %v2650_v56  ;;  %v1077_v23 = vsel %vm4290_vm0, %v2414_v48, %v2417_v49  ;;  %v1079_v7 = vsel %vm4294_vm1, %v2414_v48, %v2417_v49  ;;  %v1085_v10 = vsel %vm4290_vm0, %v2402_v44, %v2405_v45 }
 0x169   : > { %v1200_v58 = vpack.c.bf16 %v1194_v22, %v1192_v39  ;;  %vm4326_vm4 = vcmp.ne.s32.totalorder %v1045_v52, 0  ;;  %vm4330_vm5 = vcmp.ne.s32.totalorder %v1047_v17, 0  ;;  %vm4334_vm6 = vcmp.ne.s32.totalorder %v1061_v21, 0 }
 0x16a   : > { %vm4338_vm7 = vcmp.ne.s32.totalorder %v1063_v40, 0  ;;  %v1087_v61 = vsel %vm4294_vm1, %v2402_v44, %v2405_v45  ;;  %v1093_v18 = vsel %vm4301_vm2, %v1077_v23, %v1085_v10  ;;  %v1101_v12 = vsel %vm4290_vm0, %v2391_v41, %v2408_v46 }
 0x16b   : > { %1229 = vmatpush1.bf16.msra.mxu0 %v1200_v58  ;;  %v1095_v38 = vsel %vm4305_vm3, %v1079_v7, %v1087_v61  ;;  %v1103_v19 = vsel %vm4294_vm1, %v2391_v41, %v2408_v46  ;;  %v1109_v32 = vsel %vm4290_vm0, %v2367_v35, %v2370_v36  ;;  %v1111_v6 = vsel %vm4294_vm1, %v2367_v35, %v2370_v36 }
 0x16c   : > { %v1117_v47 = vsel %vm4301_vm2, %v1101_v12, %v1109_v32  ;;  %v1119_v4 = vsel %vm4305_vm3, %v1103_v19, %v1111_v6  ;;  %v1133_v42 = vsel %vm4290_vm0, %v2373_v37, %v2458_v62  ;;  %v1135_v51 = vsel %vm4294_vm1, %v2373_v37, %v2458_v62 }
 0x16d   : > { %v1125_v59 = vsel %vm4326_vm4, %v1093_v18, %v1117_v47  ;;  %v1127_v60 = vsel %vm4330_vm5, %v1095_v38, %v1119_v4  ;;  %v1141_v34 = vsel %vm4290_vm0, %v2461_v63, %v2474_v3  ;;  %v1143_v15 = vsel %vm4294_vm1, %v2461_v63, %v2474_v3 }
 0x16e   : > { %v1149_v31 = vsel %vm4301_vm2, %v1133_v42, %v1141_v34  ;;  %v1151_v5 = vsel %vm4305_vm3, %v1135_v51, %v1143_v15  ;;  %v1157_v14 = vsel %vm4290_vm0, %v2350_v28, %v2353_v29  ;;  %v1159_v1 = vsel %vm4294_vm1, %v2350_v28, %v2353_v29 }
 0x16f   : > { %v1165_v50 = vsel %vm4290_vm0, %v2339_v24, %v2497_v16  ;;  %v1167_v54 = vsel %vm4294_vm1, %v2339_v24, %v2497_v16  ;;  %v1012_v2 = vand.u32 4096, %v2789_v20  ;;  %v1014_v13 = vand.u32 4096, %v2792_v27 }
 0x170   : > { %v1173_v33 = vsel %vm4301_vm2, %v1157_v14, %v1165_v50  ;;  %v1175_v8 = vsel %vm4305_vm3, %v1159_v1, %v1167_v54  ;;  %v1028_v43 = vand.u32 8192, %v2789_v20  ;;  %v1030_v30 = vand.u32 8192, %v2792_v27  ;;  %v1676_v14 = vld [vmem:[%s4983_s2] sm:$0xff]  }
 0x171   : > { %v1181_v39 = vsel %vm4326_vm4, %v1149_v31, %v1173_v33  ;;  %v1183_v9 = vsel %vm4330_vm5, %v1151_v5, %v1175_v8  ;;  %vm4422_vm8 = vcmp.ne.s32.totalorder %v1012_v2, 0  ;;  %vm4426_vm9 = vcmp.ne.s32.totalorder %v1014_v13, 0  ;;  %v1204_v1 = vld [vmem:[#allocation2] sm:$0xff]  ;;  %v1205_v50 = vld [vmem:[#allocation2 + $0x8] sm:$0xff]  ;;  %v1206_v2 = vld [vmem:[#allocation2 + $0x10] sm:$0xff] }
 0x172   : > { %v1189_v55 = vsel %vm4334_vm6, %v1125_v59, %v1181_v39  ;;  %v1191_v52 = vsel %vm4338_vm7, %v1127_v60, %v1183_v9  ;;  %vm4434_vm10 = vcmp.ne.s32.totalorder %v1028_v43, 0  ;;  %vm4438_vm11 = vcmp.ne.s32.totalorder %v1030_v30, 0  ;;  %v1207_v8 = vld [vmem:[#allocation2 + $0x18] sm:$0xff] }
 0x173   : > { %v1197_v40 = vmul.f32 %v1189_v55, %v3481_v26  ;;  %v1199_v23 = vmul.f32 %v1191_v52, %v3481_v26  ;;  %v1044_v7 = vand.u32 16384, %v2789_v20  ;;  %v1046_v10 = vand.u32 16384, %v2792_v27 }
 0x174   : > { %v1060_v58 = vand.u32 32768, %v2789_v20  ;;  %v1062_v25 = vand.u32 32768, %v2792_v27  ;;  %v1076_v56 = vsel %vm4422_vm8, %v2414_v48, %v2417_v49  ;;  %v1078_v57 = vsel %vm4426_vm9, %v2414_v48, %v2417_v49 }
 0x175   : > { %v1203_v11 = vpack.c.bf16 %v1199_v23, %v1197_v40  ;;  %vm4456_vm12 = vcmp.ne.s32.totalorder %v1044_v7, 0  ;;  %vm4460_vm13 = vcmp.ne.s32.totalorder %v1046_v10, 0  ;;  %v1084_v20 = vsel %vm4422_vm8, %v2402_v44, %v2405_v45 }
 0x176   : > { %vm4468_vm14 = vcmp.ne.s32.totalorder %v1060_v58, 0  ;;  %vm4472_vm15 = vcmp.ne.s32.totalorder %v1062_v25, 0  ;;  %v1086_v49 = vsel %vm4426_vm9, %v2402_v44, %v2405_v45  ;;  %v1092_v18 = vsel %vm4434_vm10, %v1076_v56, %v1084_v20 }
 0x177   : > { %1230 = vmatprep.subr.bf16.mxu0 %v1203_v11  ;;  %v1094_v12 = vsel %vm4438_vm11, %v1078_v57, %v1086_v49  ;;  %v1100_v38 = vsel %vm4422_vm8, %v2391_v41, %v2408_v46  ;;  %v1102_v19 = vsel %vm4426_vm9, %v2391_v41, %v2408_v46  ;;  %v1108_v44 = vsel %vm4422_vm8, %v2367_v35, %v2370_v36 }
 0x178   : > { %v1110_v45 = vsel %vm4426_vm9, %v2367_v35, %v2370_v36  ;;  %v1116_v32 = vsel %vm4434_vm10, %v1100_v38, %v1108_v44  ;;  %v1132_v6 = vsel %vm4422_vm8, %v2373_v37, %v2458_v62  ;;  %v1134_v41 = vsel %vm4426_vm9, %v2373_v37, %v2458_v62 }
 0x179   : > { %v1118_v46 = vsel %vm4438_vm11, %v1102_v19, %v1110_v45  ;;  %v1124_v47 = vsel %vm4456_vm12, %v1092_v18, %v1116_v32  ;;  %v1140_v35 = vsel %vm4422_vm8, %v2461_v63, %v2474_v3  ;;  %v1142_v36 = vsel %vm4426_vm9, %v2461_v63, %v2474_v3 }
 0x17a   : > { %v1126_v4 = vsel %vm4460_vm13, %v1094_v12, %v1118_v46  ;;  %v1148_v37 = vsel %vm4434_vm10, %v1132_v6, %v1140_v35  ;;  %v1150_v62 = vsel %vm4438_vm11, %v1134_v41, %v1142_v36  ;;  %v1156_v42 = vsel %vm4422_vm8, %v2350_v28, %v2353_v29 }
 0x17b   : > { %v1158_v63 = vsel %vm4426_vm9, %v2350_v28, %v2353_v29  ;;  %v1164_v3 = vsel %vm4422_vm8, %v2339_v24, %v2497_v16  ;;  %v1166_v51 = vsel %vm4426_vm9, %v2339_v24, %v2497_v16  ;;  %v1932_v34 = vmov 0  }
 0x17c   : > { %v1172_v59 = vsel %vm4434_vm10, %v1156_v42, %v1164_v3  ;;  %v1174_v60 = vsel %vm4438_vm11, %v1158_v63, %v1166_v51  ;;  %1248 = vmatprep.mubr.bf16.mxu0 %v1932_v34 }
 0x17d   : > { %v1180_v28 = vsel %vm4456_vm12, %v1148_v37, %v1172_v59  ;;  %v1182_v29 = vsel %vm4460_vm13, %v1150_v62, %v1174_v60 }
 0x17e   : > { %v1188_v15 = vsel %vm4468_vm14, %v1124_v47, %v1180_v28  ;;  %v1190_v24 = vsel %vm4472_vm15, %v1126_v4, %v1182_v29 }
 0x17f   : > { %v1196_v16 = vmul.f32 %v1188_v15, %v3604_v0  ;;  %v1198_v31 = vmul.f32 %v1190_v24, %v3604_v0 }
 0x181   : > { %v1202_v5 = vpack.c.bf16 %v1198_v31, %v1196_v16 }
 0x183   : > { %1231 = vmatpush1.bf16.msra.mxu0 %v1202_v5 }
 0x186   : > { %1249 = vmatmul.mubr.bf16.vlgmr.msra.gmra.mrb[0].mxu0 %v1676_v14 }
 0x259   : > { %v1250_v54 = vpop.f32.mrb[0].mxu0  ;;  %1270 = sbr.rel (%p1492_p2) target bundleno = 618 (0x26a), region = 56 }
 0x25a   : > { %v1259_v13 = vadd.f32 %v1250_v54, %v1204_v1  ;;  %v1252_v33 = vpop.f32.mrb[1].mxu0 }
 0x25b   : > { %v1260_v43 = vadd.f32 %v1252_v33, %v1205_v50  ;;  %v1254_v30 = vpop.f32.mrb[2].mxu0 }
 0x25c   : > { %1263 = vst [vmem:[#allocation2] sm:$0xff] %v1259_v13  ;;  %v1261_v39 = vadd.f32 %v1254_v30, %v1206_v2  ;;  %v1256_v9 = vpop.f32.mrb[3].mxu0 }
 0x25d   : > { %1264 = vst [vmem:[#allocation2 + $0x8] sm:$0xff] %v1260_v43  ;;  %v1262_v22 = vadd.f32 %v1256_v9, %v1207_v8 }
 0x25e   : > { %1265 = vst [vmem:[#allocation2 + $0x10] sm:$0xff] %v1261_v39 }
 0x25f   : > { %1266 = vst [vmem:[#allocation2 + $0x18] sm:$0xff] %v1262_v22 }
 0x263   : > { %v1271_v0 = vld [vmem:[#allocation2] sm:$0xff] }
 0x264   : > { %v1272_v53 = vld [vmem:[#allocation2 + $0x8] sm:$0xff] }
 0x265   : > { %v1273_v55 = vld [vmem:[#allocation2 + $0x10] sm:$0xff]  ;;  %v1504_v52 = vpack.c.bf16 %v1272_v53, %v1271_v0 }
 0x266   : > { %v1274_v17 = vld [vmem:[#allocation2 + $0x18] sm:$0xff] }
 0x267   : > { %v1505_v21 = vpack.c.bf16 %v1274_v17, %v1273_v55  ;;  %1287 = vst [vmem:[%s2279_s30] sm:$0xff] %v1504_v52 }
 0x269   : > { %1288 = vst [vmem:[%s2279_s30 + $0x8] sm:$0xff] %v1505_v21 }
 0x26a PF: > { %s4985_s10 = sld [smem:[#allocation19_spill]]  ;;  %s4986_s8 = sld [smem:[#allocation16_spill]] }
 0x26b   : > { %s4987_s11 = sld [smem:[#allocation21_spill]]  ;;  %s1306_s12 = sshll.u32 %s2279_s30, 4  ;;  %s4566_s12 = int_to_ptr.vmem [resolvable:$true] %s1306_s12 }
 0x26c   : > { %s4988_s14 = sld [smem:[#allocation29_spill]]  ;;  %s1750_s6 = scalar_lea.vmem %s4566_s12, 256 }
 0x26d   : > { %p1751_p5 = scmp.ne.s32.totalorder %s4566_s12, %s1750_s6 }
 0x270   : > { %s1506_s1 = sshll.u32 %s4985_s10, 3  ;;  %s4989_s9 = sand.u32 1, %s4986_s8  }
 0x271   : > { %s1303_s4 = sadd.s32 %s1506_s1, %s2268_s25  ;;  %s4575_s13 = scalar_lea.sflag [#allocation5], %s4989_s9 }
 0x272   : > { %s1499_s15 = sshll.u32 %s1303_s4, 6  ;;  %p4990_p10 = scmp.ne.s32.totalorder %s4987_s11, 0 }
 0x273   : > { %s4571_s26 = scalar_lea.hbm %s4988_s14, %s1499_s15  ;;  %s1933_s25 = smov [#allocation10]  }
 0x274   : > { %p1752_p9 = pnand %p1751_p5, %p4990_p10  ;;  %s1754_s30 = sshll.u32 %s1933_s25, 4  ;;  %s1755_s30 = int_to_ptr.vmem [resolvable:$false] %s1754_s30 }
 0x275   : > { %s1756_s16 = scalar_lea.vmem %s1755_s30, 512  ;;  %p1757_p13 = scmp.lt.s32.totalorder %s4566_s12, %s1755_s30 }
 0x276   : > { %p1753_p7 = pneg %p1752_p9  ;;  %p1758_p4 = scmp.lt.s32.totalorder %s1756_s16, %s1750_s6 }
 0x278   : > { %p1759_p0 = por %p1758_p4, %p1757_p13 }
 0x27a   : > { %p1760_p11 = pnand %p1759_p0, %p1753_p7 }
 0x27c   : > { %1763 = shalt.err (!%p1760_p11)
}
 0x27d   : > { %s1764_s2 = scalar_lea.hbm %s4571_s26, 256  ;;  %s1768_s8 = scalar_lea.hbm %s4988_s14, 1024 }
 0x27e   : > { %p1765_p1 = scmp.ne.s32.totalorder %s4571_s26, %s1764_s2  ;;  %p1769_p6 = scmp.lt.u32.totalorder %s4571_s26, %s4988_s14 }
 0x27f   : > { %p1770_p3 = scmp.lt.u32.totalorder %s1768_s8, %s1764_s2  ;;  %p1772_p5 = scmp.lt.u32.totalorder %s1764_s2, %s4571_s26 }
 0x280   : > { %p1766_p12 = pnand %p1765_p1, %p4990_p10 }
 0x281   : > { %p1771_p2 = por %p1770_p3, %p1769_p6 }
 0x282   : > { %p1767_p8 = pneg %p1766_p12 }
 0x283   : > { %p1773_p9 = por %p1772_p5, %p1771_p2 }
 0x285   : > { %p1774_p7 = pnand %p1773_p9, %p1767_p8 }
 0x287   : > { %1777 = shalt.err (!%p1774_p7)
}
 0x288   : > { %s1934_s15 = smov 128   ;;  %s1935_s21 = smov 256  }
 0x289   : > { %s1936_s0 = smov 8  }
 0x28a   : > { %1515 = dma.vmem_to_hbm [thread:$0]  (%p4990_p10), %s4566_s12, 256, %s4571_s26, %s4575_s13, %s1934_s15, %s1935_s21, %s1936_s0  }
 0x28b PF: > { %s4991_s9 = sld [smem:[#allocation20_spill]]  ;;  %s4992_s6 = sld [smem:[#allocation15_spill]] }
 0x28c   : > { %s4993_s25 = sld [smem:[#allocation22_spill]] }
 0x291   : > { %p1535_p13 = scmp.ge.s32.totalorder %s4991_s9, 2  ;;  %s1321_s30 = sand.u32 1, %s4992_s6  }
 0x292   : > { %p4994_p4 = scmp.ne.s32.totalorder %s4993_s25, 0  ;;  %s1322_s16 = scalar_lea.sflag [#allocation5], %s1321_s30 }
 0x294   : > { %p1529_p0 = pnand %p1535_p13, %p4994_p4 }
 0x296   : > { %1855 = dma.done.wait (!%p1529_p0), %s1322_s16, 256  }
 0x297   : > { %1857 = vsyncadd (!%p1529_p0), %s1322_s16, 4294967040  ;;  %s24_s30 = sadd.s32 1, %s4991_s9   ;;  %s4996_s15 = sld [smem:[#allocation16_spill]] }
 0x298   : > { %p4604_p11 = scmp.ge.s32.totalorder %s24_s30, 10   ;;  %s4997_s11 = sld [smem:[#allocation23_spill]] }
 0x299   : > { %s4998_s12 = sld [smem:[#allocation24_spill]]  ;;  %s4999_s16 = smov %s1868_s17 }
 0x29a   : > { %s5000_s17 = smov %s2214_s18  ;;  %s5001_s18 = smov %s1876_s19 }
 0x29b   : > { %s5002_s19 = smov %s1880_s20  ;;  %s5003_s20 = smov %s2199_s3 }
 0x29c   : > { %s5004_s21 = smov %s1888_s22  ;;  %s5005_s22 = smov %s1892_s23 }
 0x29d   : > { %s5006_s23 = smov %s2209_s24  ;;  %s5007_s24 = smov %s1908_s27 }
 0x29e   : > { %s5008_s25 = smov %s1912_s28  ;;  %s5009_s26 = smov %s1916_s29 }
 0x29f   : > { %s5010_s27 = smov %s4997_s11  ;;  %s5011_s28 = smov %s4998_s12 }
 0x2a0   : > { %s5012_s29 = smov %s5022_s5  ;;  %23 = sbr.rel (!%p4604_p11) target bundleno = 20 (0x14), region = 110 }
 0x2a7   :  { %1327 = vsyncpa [#allocation4], 1 }
 0x2a8   :  { %1329 = vsyncpa [#allocation4 + $0x1], 1 }
 0x2a9   :  { %1330 = vsyncpa [#allocation9], 1 }
 0x2aa   :  { %1332 = vsyncpa [#allocation9 + $0x1], 1 }
 0x2ab   :  { %1333 = vsyncpa [#allocation5], 1 }
 0x2ac   :  { %1335 = vsyncpa [#allocation5 + $0x1], 1 }
 0x2ad   :  { %1336 = vsyncpa [#allocation6], 1 }
 0x2ae   :  { %1338 = vsyncpa [#allocation6 + $0x1], 1 }

</bundles_post_ra>
